<compile_context>
chip_gen: v6e
topology: v6e:2x2x1
jax: 0.10.0
libtpu: 0.0.40
codegen_flags: <defaults>
</compile_context>

<pallas_src>
import math

import jax
import jax.numpy as jnp
from jax.experimental import pallas as pl
from jax.experimental.pallas import tpu as pltpu

# ----- config (matches config_density_mlp / config_color_mlp, is_fine=True) -----
N_LEVELS = 16
F_PER_LEVEL = 2
LOG2_T = 15
TABLE_SIZE = 1 << LOG2_T          # 32768 entries per level
BASE_RES = 16
PER_LEVEL_SCALE = 1.5
ENC_DIM = N_LEVELS * F_PER_LEVEL  # 32
DENSITY_HIDDEN = 64
DENSITY_OUT = 16
SH_DIM = 16                       # SphericalHarmonics degree 4
COLOR_IN = SH_DIM + DENSITY_OUT   # 32
COLOR_HIDDEN = 64
COLOR_OUT = 3
TILE_N = 512                      # rows per grid step


# ---------------------------------------------------------------------------
# Hash-grid encoding (plain JAX: one batched gather over a flattened table)
# ---------------------------------------------------------------------------
def hash_grid_encode(pts, tables_flat):
    """pts: [N,3] in [0,1]; tables_flat: [L*TABLE_SIZE, F]. Returns [N, 32] f32."""
    n = pts.shape[0]
    levels = jnp.arange(N_LEVELS, dtype=jnp.float32)
    scales = BASE_RES * (PER_LEVEL_SCALE ** levels) - 1.0            # [L]
    pos = pts.astype(jnp.float32)[:, None, :] * scales[None, :, None] + 0.5  # [N,L,3]
    pos0f = jnp.floor(pos)
    frac = pos - pos0f                                               # [N,L,3]
    pos0 = pos0f.astype(jnp.uint32)                                  # [N,L,3]

    # 8 cube corners
    corners = jnp.array([[c & 1, (c >> 1) & 1, (c >> 2) & 1] for c in range(8)],
                        dtype=jnp.uint32)                            # [8,3]
    corner_pos = pos0[:, :, None, :] + corners[None, None, :, :]     # [N,L,8,3]

    # TODO(synk): tcnn uses dense (non-hashed) indexing for levels whose grid fits the
    # table; parameters here are synthetic so all levels use the spatial hash.
    primes = jnp.array([1, 2654435761, 805459861], dtype=jnp.uint32)
    h = corner_pos * primes                                          # uint32 wrap, as tcnn
    idx = (h[..., 0] ^ h[..., 1] ^ h[..., 2]) & jnp.uint32(TABLE_SIZE - 1)  # [N,L,8]
    level_off = (jnp.arange(N_LEVELS, dtype=jnp.uint32) * TABLE_SIZE)[None, :, None]
    flat_idx = (idx + level_off).astype(jnp.int32)                   # [N,L,8]

    # trilinear interpolation weights
    cf = corners.astype(jnp.float32)                                 # [8,3]
    w = jnp.prod(jnp.where(cf[None, None, :, :] > 0,
                           frac[:, :, None, :], 1.0 - frac[:, :, None, :]),
                 axis=-1)                                            # [N,L,8]

    vals = tables_flat[flat_idx]                                     # [N,L,8,F]
    feat = jnp.sum(w[..., None] * vals, axis=2)                      # [N,L,F]
    return feat.reshape(n, N_LEVELS * F_PER_LEVEL)                   # [N,32]


# ---------------------------------------------------------------------------
# Spherical harmonics (degree 4) on viewdir — lane-dense in the XLA wrapper.
# tcnn maps [0,1] -> [-1,1].
# ---------------------------------------------------------------------------
def sh_encode_deg4(viewdir):
    d = viewdir.astype(jnp.float32) * 2.0 - 1.0
    x, y, z = d[:, 0], d[:, 1], d[:, 2]
    xx, yy, zz = x * x, y * y, z * z
    xy, yz, xz = x * y, y * z, x * z
    sh = jnp.stack([
        jnp.full_like(x, 0.28209479177387814),
        -0.48860251190291987 * y,
        0.48860251190291987 * z,
        -0.48860251190291987 * x,
        1.0925484305920792 * xy,
        -1.0925484305920792 * yz,
        0.94617469575755997 * zz - 0.31539156525251999,
        -1.0925484305920792 * xz,
        0.54627421529603959 * (xx - yy),
        0.59004358992664352 * y * (-3.0 * xx + yy),
        2.8906114426405538 * xy * z,
        0.45704579946446572 * y * (1.0 - 5.0 * zz),
        0.3731763325901154 * z * (5.0 * zz - 3.0),
        0.45704579946446572 * x * (1.0 - 5.0 * zz),
        1.4453057213202769 * z * (xx - yy),
        0.59004358992664352 * x * (-xx + 3.0 * yy),
    ], axis=-1)
    return sh                                                        # [N,16]


# ---------------------------------------------------------------------------
# Fused NeRF MLP kernel (density MLP -> folded color MLP -> out)
# ---------------------------------------------------------------------------
def nerf_kernel(feat_ref, sh_ref, wd0_ref, wd1_ref, wfused_ref, wsig_ref,
                wc0sh_ref, wc1_ref, out_ref):
    f32 = jnp.float32
    bf16 = jnp.bfloat16

    # ----- density MLP hidden layers (FullyFusedMLP, no bias): 32 -> 64 -> 64 -----
    h = jnp.dot(feat_ref[...], wd0_ref[...], preferred_element_type=f32)
    h = jnp.maximum(h, 0.0).astype(bf16)
    h = jnp.dot(h, wd1_ref[...], preferred_element_type=f32)
    h = jnp.maximum(h, 0.0).astype(bf16)                              # [TN,64] bf16

    # ----- density output folded into the color path:
    #   x16 = h @ wd2 ; log_density = x16[:, :1] = h @ wd2[:, :1]
    #   cat(sh, x16) @ wc0 = sh @ wc0[:16, :] + h @ (wd2 @ wc0[16:, :])
    log_density = jnp.dot(h, wsig_ref[...], preferred_element_type=f32)       # [TN,1]
    c = (jnp.dot(h, wfused_ref[...], preferred_element_type=f32)
         + jnp.dot(sh_ref[...], wc0sh_ref[...], preferred_element_type=f32))  # [TN,64]
    c = jnp.maximum(c, 0.0).astype(bf16)
    rgb = jnp.dot(c, wc1_ref[...], preferred_element_type=f32)                # [TN,3]

    # ----- output: cat(rgb, exp(log_density)) — single store -----
    out_ref[...] = jnp.concatenate([rgb, jnp.exp(log_density)], axis=-1)


def nerf_forward(pts, viewdir, params):
    """pts, viewdir: [N, 3] f32 in [0,1]. Returns [N, 4] f32 (rgb, sigma)."""
    tables, wd0, wd1, wd2, wc0, wc1 = params
    n = pts.shape[0]
    n_pad = pl.cdiv(n, TILE_N) * TILE_N
    if n_pad != n:
        pad = n_pad - n
        pts = jnp.pad(pts, ((0, pad), (0, 0)))
        viewdir = jnp.pad(viewdir, ((0, pad), (0, 0)))

    bf16 = jnp.bfloat16

    # Encodings (data-dependent gather / lane-dense SH stay in XLA), cast to bf16
    # to halve the per-point HBM stream into the kernel.
    tables_flat = tables.reshape(N_LEVELS * TABLE_SIZE, F_PER_LEVEL)
    feat = hash_grid_encode(pts, tables_flat).astype(bf16)            # [Np, 32]
    sh = sh_encode_deg4(viewdir).astype(bf16)                         # [Np, 16]

    # Weight preprocessing: fold wd2 into the color first layer, split out the
    # sigma column; bf16 MXU operands (original tcnn module is fp16).
    w_fused = (wd2 @ wc0[SH_DIM:, :]).astype(bf16)                    # [64, 64]
    w_sigma = wd2[:, :1].astype(bf16)                                 # [64, 1]
    wc0_sh = wc0[:SH_DIM, :].astype(bf16)                             # [16, 64]
    wd0b = wd0.astype(bf16)                                           # [32, 64]
    wd1b = wd1.astype(bf16)                                           # [64, 64]
    wc1b = wc1.astype(bf16)                                           # [64, 3]

    def weight_spec(shape):
        return pl.BlockSpec(shape, lambda i: (0, 0))

    out = pl.pallas_call(
        nerf_kernel,
        out_shape=jax.ShapeDtypeStruct((n_pad, 4), jnp.float32),
        grid_spec=pltpu.PrefetchScalarGridSpec(
            num_scalar_prefetch=0,
            grid=(n_pad // TILE_N,),
            in_specs=[
                pl.BlockSpec((TILE_N, ENC_DIM), lambda i: (i, 0)),   # hash features
                pl.BlockSpec((TILE_N, SH_DIM), lambda i: (i, 0)),    # SH(viewdir)
                weight_spec(wd0b.shape),                             # density W0 [32,64]
                weight_spec(wd1b.shape),                             # density W1 [64,64]
                weight_spec(w_fused.shape),                          # fused wd2@wc0 [64,64]
                weight_spec(w_sigma.shape),                          # sigma column [64,1]
                weight_spec(wc0_sh.shape),                           # color SH rows [16,64]
                weight_spec(wc1b.shape),                             # color W1 [64,3]
            ],
            out_specs=pl.BlockSpec((TILE_N, 4), lambda i: (i, 0)),
        ),
        compiler_params=pltpu.CompilerParams(dimension_semantics=("parallel",)),
    )(feat, sh, wd0b, wd1b, w_fused, w_sigma, wc0_sh, wc1b)
    return out[:n]


def init_params(key):
    ks = jax.random.split(key, 6)
    # Hash tables: tcnn initializes U(-1e-4, 1e-4).
    tables = jax.random.uniform(
        ks[0], (N_LEVELS, TABLE_SIZE, F_PER_LEVEL), jnp.float32, -1e-4, 1e-4)

    def dense(k, fan_in, fan_out):
        return (jax.random.normal(k, (fan_in, fan_out), jnp.float32)
                * (1.0 / math.sqrt(fan_in)))

    wd0 = dense(ks[1], ENC_DIM, DENSITY_HIDDEN)         # 32 -> 64
    wd1 = dense(ks[2], DENSITY_HIDDEN, DENSITY_HIDDEN)  # 64 -> 64
    wd2 = dense(ks[3], DENSITY_HIDDEN, DENSITY_OUT)     # 64 -> 16
    wc0 = dense(ks[4], COLOR_IN, COLOR_HIDDEN)          # 32 -> 64
    wc1 = dense(ks[5], COLOR_HIDDEN, COLOR_OUT)         # 64 -> 3
    return tables, wd0, wd1, wd2, wc0, wc1


if __name__ == "__main__":
    key = jax.random.PRNGKey(0)
    k_pts, k_dir, k_par = jax.random.split(key, 3)

    N = 1024  # grid of 2 tiles at TILE_N=512 (keeps both v7x TensorCores busy)
    pts = jax.random.uniform(k_pts, (N, 3), jnp.float32)       # positions in [0,1]^3
    viewdir = jax.random.uniform(k_dir, (N, 3), jnp.float32)   # dirs in [0,1]^3 (tcnn conv.)
    params = init_params(k_par)

    out = nerf_forward(pts, viewdir, params)
    out = jax.block_until_ready(out)
    assert out.shape == (N, 4) and out.dtype == jnp.float32
    assert bool(jnp.all(jnp.isfinite(out)))
    assert bool(jnp.all(out[:, 3] > 0.0))  # sigma = exp(...) > 0
    print("KERNEL_OK")
</pallas_src>

<mosaic_0001>
module attributes {stable_mosaic.version = 11 : i64} {
  func.func @nerf_kernel(%arg0: i32, %arg1: memref<512x32xbf16, #tpu.memory_space<vmem>>, %arg2: memref<512x16xbf16, #tpu.memory_space<vmem>>, %arg3: memref<32x64xbf16, #tpu.memory_space<vmem>>, %arg4: memref<64x64xbf16, #tpu.memory_space<vmem>>, %arg5: memref<64x64xbf16, #tpu.memory_space<vmem>>, %arg6: memref<64x1xbf16, #tpu.memory_space<vmem>>, %arg7: memref<16x64xbf16, #tpu.memory_space<vmem>>, %arg8: memref<64x3xbf16, #tpu.memory_space<vmem>>, %arg9: memref<512x4xf32, #tpu.memory_space<vmem>>) attributes {dimension_semantics = [#tpu.dimension_semantics<parallel>], iteration_bounds = array<i64: 2>, scalar_prefetch = 0 : i64, scratch_operands = 0 : i64, tpu.core_type = #tpu.core_type<tc>, window_params = [{transform_indices = @transform_0, window_bounds = array<i64: 512, 32>}, {transform_indices = @transform_1, window_bounds = array<i64: 512, 16>}, {pipeline_mode = #tpu.pipeline_mode<synchronous>, transform_indices = @transform_2, window_bounds = array<i64: 32, 64>}, {pipeline_mode = #tpu.pipeline_mode<synchronous>, transform_indices = @transform_3, window_bounds = array<i64: 64, 64>}, {pipeline_mode = #tpu.pipeline_mode<synchronous>, transform_indices = @transform_4, window_bounds = array<i64: 64, 64>}, {pipeline_mode = #tpu.pipeline_mode<synchronous>, transform_indices = @transform_5, window_bounds = array<i64: 64, 1>}, {pipeline_mode = #tpu.pipeline_mode<synchronous>, transform_indices = @transform_6, window_bounds = array<i64: 16, 64>}, {pipeline_mode = #tpu.pipeline_mode<synchronous>, transform_indices = @transform_7, window_bounds = array<i64: 64, 3>}, {transform_indices = @transform_8, window_bounds = array<i64: 512, 4>}]} {
    %c0 = arith.constant 0 : index
    %c0_0 = arith.constant 0 : index
    %0 = vector.load %arg1[%c0, %c0_0] : memref<512x32xbf16, #tpu.memory_space<vmem>>, vector<512x32xbf16>
    %c0_1 = arith.constant 0 : index
    %c0_2 = arith.constant 0 : index
    %1 = vector.load %arg3[%c0_1, %c0_2] : memref<32x64xbf16, #tpu.memory_space<vmem>>, vector<32x64xbf16>
    %cst = arith.constant dense<0.000000e+00> : vector<512x64xf32>
    %2 = tpu.matmul %0, %1, %cst {dimension_numbers = #tpu.dot_dimension_numbers<[1], [0], [0], [1], [0, 0, 1, 1], [], []>} : vector<512x32xbf16>, vector<32x64xbf16>, vector<512x64xf32> -> vector<512x64xf32>
    %cst_3 = arith.constant 0.000000e+00 : f32
    %3 = vector.broadcast %cst_3 : f32 to vector<512x64xf32>
    %4 = arith.maximumf %2, %3 : vector<512x64xf32>
    %5 = arith.truncf %4 : vector<512x64xf32> to vector<512x64xbf16>
    %c0_4 = arith.constant 0 : index
    %c0_5 = arith.constant 0 : index
    %6 = vector.load %arg4[%c0_4, %c0_5] : memref<64x64xbf16, #tpu.memory_space<vmem>>, vector<64x64xbf16>
    %cst_6 = arith.constant dense<0.000000e+00> : vector<512x64xf32>
    %7 = tpu.matmul %5, %6, %cst_6 {dimension_numbers = #tpu.dot_dimension_numbers<[1], [0], [0], [1], [0, 0, 1, 1], [], []>} : vector<512x64xbf16>, vector<64x64xbf16>, vector<512x64xf32> -> vector<512x64xf32>
    %cst_7 = arith.constant 0.000000e+00 : f32
    %8 = vector.broadcast %cst_7 : f32 to vector<512x64xf32>
    %9 = arith.maximumf %7, %8 : vector<512x64xf32>
    %10 = arith.truncf %9 : vector<512x64xf32> to vector<512x64xbf16>
    %c0_8 = arith.constant 0 : index
    %c0_9 = arith.constant 0 : index
    %11 = vector.load %arg6[%c0_8, %c0_9] : memref<64x1xbf16, #tpu.memory_space<vmem>>, vector<64x1xbf16>
    %cst_10 = arith.constant dense<0.000000e+00> : vector<512x1xf32>
    %12 = tpu.matmul %10, %11, %cst_10 {dimension_numbers = #tpu.dot_dimension_numbers<[1], [0], [0], [1], [0, 0, 1, 1], [], []>} : vector<512x64xbf16>, vector<64x1xbf16>, vector<512x1xf32> -> vector<512x1xf32>
    %c0_11 = arith.constant 0 : index
    %c0_12 = arith.constant 0 : index
    %13 = vector.load %arg5[%c0_11, %c0_12] : memref<64x64xbf16, #tpu.memory_space<vmem>>, vector<64x64xbf16>
    %cst_13 = arith.constant dense<0.000000e+00> : vector<512x64xf32>
    %14 = tpu.matmul %10, %13, %cst_13 {dimension_numbers = #tpu.dot_dimension_numbers<[1], [0], [0], [1], [0, 0, 1, 1], [], []>} : vector<512x64xbf16>, vector<64x64xbf16>, vector<512x64xf32> -> vector<512x64xf32>
    %c0_14 = arith.constant 0 : index
    %c0_15 = arith.constant 0 : index
    %15 = vector.load %arg2[%c0_14, %c0_15] : memref<512x16xbf16, #tpu.memory_space<vmem>>, vector<512x16xbf16>
    %c0_16 = arith.constant 0 : index
    %c0_17 = arith.constant 0 : index
    %16 = vector.load %arg7[%c0_16, %c0_17] : memref<16x64xbf16, #tpu.memory_space<vmem>>, vector<16x64xbf16>
    %cst_18 = arith.constant dense<0.000000e+00> : vector<512x64xf32>
    %17 = tpu.matmul %15, %16, %cst_18 {dimension_numbers = #tpu.dot_dimension_numbers<[1], [0], [0], [1], [0, 0, 1, 1], [], []>} : vector<512x16xbf16>, vector<16x64xbf16>, vector<512x64xf32> -> vector<512x64xf32>
    %18 = arith.addf %14, %17 : vector<512x64xf32>
    %cst_19 = arith.constant 0.000000e+00 : f32
    %19 = vector.broadcast %cst_19 : f32 to vector<512x64xf32>
    %20 = arith.maximumf %18, %19 : vector<512x64xf32>
    %21 = arith.truncf %20 : vector<512x64xf32> to vector<512x64xbf16>
    %c0_20 = arith.constant 0 : index
    %c0_21 = arith.constant 0 : index
    %22 = vector.load %arg8[%c0_20, %c0_21] : memref<64x3xbf16, #tpu.memory_space<vmem>>, vector<64x3xbf16>
    %cst_22 = arith.constant dense<0.000000e+00> : vector<512x3xf32>
    %23 = tpu.matmul %21, %22, %cst_22 {dimension_numbers = #tpu.dot_dimension_numbers<[1], [0], [0], [1], [0, 0, 1, 1], [], []>} : vector<512x64xbf16>, vector<64x3xbf16>, vector<512x3xf32> -> vector<512x3xf32>
    %24 = math.exp %12 : vector<512x1xf32>
    %25 = tpu.concatenate %23, %24 in 1 : vector<512x3xf32>, vector<512x1xf32> -> vector<512x4xf32>
    %c0_23 = arith.constant 0 : index
    %c0_24 = arith.constant 0 : index
    %26 = vector.load %arg9[%c0_23, %c0_24] : memref<512x4xf32, #tpu.memory_space<vmem>>, vector<512x4xf32>
    tpu.vector_store %arg9[%c0_23, %c0_24], %25 {strides = array<i32>} : memref<512x4xf32, #tpu.memory_space<vmem>>, vector<512x4xf32>,
    return
  }
  func.func @transform_0(%arg0: i32) -> (i32, i32) {
    %c0_i32 = arith.constant 0 : i32
    %c0_i32_0 = arith.constant 0 : i32
    return %arg0, %c0_i32 : i32, i32
  }
  func.func @transform_1(%arg0: i32) -> (i32, i32) {
    %c0_i32 = arith.constant 0 : i32
    %c0_i32_0 = arith.constant 0 : i32
    return %arg0, %c0_i32 : i32, i32
  }
  func.func @transform_2(%arg0: i32) -> (i32, i32) {
    %c0_i32 = arith.constant 0 : i32
    %c0_i32_0 = arith.constant 0 : i32
    %c0_i32_1 = arith.constant 0 : i32
    return %c0_i32, %c0_i32_0 : i32, i32
  }
  func.func @transform_3(%arg0: i32) -> (i32, i32) {
    %c0_i32 = arith.constant 0 : i32
    %c0_i32_0 = arith.constant 0 : i32
    %c0_i32_1 = arith.constant 0 : i32
    return %c0_i32, %c0_i32_0 : i32, i32
  }
  func.func @transform_4(%arg0: i32) -> (i32, i32) {
    %c0_i32 = arith.constant 0 : i32
    %c0_i32_0 = arith.constant 0 : i32
    %c0_i32_1 = arith.constant 0 : i32
    return %c0_i32, %c0_i32_0 : i32, i32
  }
  func.func @transform_5(%arg0: i32) -> (i32, i32) {
    %c0_i32 = arith.constant 0 : i32
    %c0_i32_0 = arith.constant 0 : i32
    %c0_i32_1 = arith.constant 0 : i32
    return %c0_i32, %c0_i32_0 : i32, i32
  }
  func.func @transform_6(%arg0: i32) -> (i32, i32) {
    %c0_i32 = arith.constant 0 : i32
    %c0_i32_0 = arith.constant 0 : i32
    %c0_i32_1 = arith.constant 0 : i32
    return %c0_i32, %c0_i32_0 : i32, i32
  }
  func.func @transform_7(%arg0: i32) -> (i32, i32) {
    %c0_i32 = arith.constant 0 : i32
    %c0_i32_0 = arith.constant 0 : i32
    %c0_i32_1 = arith.constant 0 : i32
    return %c0_i32, %c0_i32_0 : i32, i32
  }
  func.func @transform_8(%arg0: i32) -> (i32, i32) {
    %c0_i32 = arith.constant 0 : i32
    %c0_i32_0 = arith.constant 0 : i32
    return %arg0, %c0_i32 : i32, i32
  }
}

</mosaic_0001>

<bundles_post_ra>
// kernel: tpu_custom_call.1
= control target key start
LH: loop header
LB: loop body
LE: loop exit
PB: predicated region body
PF: predicated region fallthrough
CT: control target
= control target key end

     0   :  { %s5214_s27 = smov 0   ;;  %s6155_s0 = inlined_call_operand.vmem [shape: bf16[1024,32], index: 0, kind: input, shape index: {}]   ;;  %s6156_s1 = inlined_call_operand.vmem [shape: bf16[1024,16], index: 1, kind: input, shape index: {}]   ;;  %s6157_s2 = inlined_call_operand.vmem [shape: bf16[32,64], index: 2, kind: input, shape index: {}]   ;;  %s6158_s3 = inlined_call_operand.vmem [shape: bf16[64,64], index: 3, kind: input, shape index: {}]   ;;  %s6159_s4 = inlined_call_operand.vmem [shape: bf16[64,64], index: 4, kind: input, shape index: {}]   ;;  %s6160_s5 = inlined_call_operand.vmem [shape: bf16[64,1], index: 5, kind: input, shape index: {}]   ;;  %s6161_s6 = inlined_call_operand.vmem [shape: bf16[16,64], index: 6, kind: input, shape index: {}]   ;;  %s6162_s7 = inlined_call_operand.vmem [shape: bf16[64,3], index: 7, kind: input, shape index: {}]   ;;  %s6163_s8 = inlined_call_operand.vmem [shape: f32[1024,4], index: 8, kind: output, shape index: {}]  }
   0x1 LB: > { %s4019_s28 = sadd.s32 4294967295, %s5166_s27   ;;  %p4023_p0 = scmp.ge.s32.totalorder %s5166_s27, 1  ;;  %s5166_s27 = sphi %s5214_s27, %s18_s27  }
   0x2   : > { %p274_p1 = scmp.lt.s32.totalorder %s5166_s27, 3 }
   0x4   : > { %p275_p2 = pnand %p4023_p0, %p274_p1 }
   0x5   : > { %s4024_s9 = sshll.u32 (!%p275_p2), %s4019_s28, 6  ;;  %s5168_s13 = smov (!%p275_p2), 3  }
   0x6   : > { %278 = sbr.rel (%p275_p2) target bundleno = 1083 (0x43b), region = 52  ;;  %p314_p3 = scmp.lt.s32.totalorder (!%p275_p2), %s4024_s9, 127 }
   0xb   : > { %v4949_v0 = vld [vmem:[%s6157_s2 + $0x8] sm:$0xff]   ;;  %v4950_v1 = vld [vmem:[%s6157_s2] sm:$0xff]   ;;  %v4983_v2 = vld [vmem:[%s6158_s3 + $0x18] sm:$0xff]   ;;  %s6165_s9 = smov (!%p314_p3, %s4024_s9), 127  ;;  %vm572_vm0 = vcmask 261120   ;;  %vm1086_vm1 = vcmask 523264  }
   0xc   : > { %4518 = vmatprep.subr.bf16.mxu0 %v4949_v0  ;;  %4586 = vmatprep.subr.bf16.mxu1 %v4983_v2  ;;  %s4025_s14 = sshll.u32 %s6165_s9, 2  ;;  %v4984_v22 = vld [vmem:[%s6158_s3 + $0x10] sm:$0xff]   ;;  %v4985_v23 = vld [vmem:[%s6158_s3 + $0x8] sm:$0xff]   ;;  %v4986_v26 = vld [vmem:[%s6158_s3] sm:$0xff]   ;;  %vm2225_vm2 = vcmask 130048   ;;  %vm3821_vm3 = vcmask 23552  }
   0xd   : > { %4519 = vmatpush3.bf16.msra.mxu0 %v4949_v0  ;;  %4587 = vmatpush3.bf16.msra.mxu1 %v4983_v2  ;;  %s5237_s17 = scalar_lea.vmem %s6155_s0, %s4025_s14  ;;  %s5262_s20 = scalar_lea.vmem %s6156_s1, %s4025_s14  ;;  %v4987_v38 = vld [vmem:[%s6160_s5 + $0x18] sm:$0xff]   ;;  %v4988_v39 = vld [vmem:[%s6160_s5 + $0x10] sm:$0xff]   ;;  %v4989_v43 = vld [vmem:[%s6160_s5 + $0x8] sm:$0xff]   ;;  %vm3886_vm4 = vcmask 31744  }
   0xe   : > { %4520 = vmatprep.subr.bf16.mxu0 %v4950_v1  ;;  %v4951_v3 = vld [vmem:[%s5237_s17] sm:$0xff]   ;;  %v4952_v4 = vld [vmem:[%s5237_s17 + $0x8] sm:$0xff]   ;;  %v4953_v5 = vld [vmem:[%s5237_s17 + $0x10] sm:$0xff]   ;;  %4588 = vmatprep.subr.bf16.mxu1 %v4984_v22  ;;  %s4029_s14 = sshll.u32 %s6165_s9, 3 }
   0xf   : > { %4522 = vmatprep.mubr.msk.bf16.mxu0 %vm572_vm0, %v4951_v3  ;;  %v4954_v6 = vld [vmem:[%s5237_s17 + $0x18] sm:$0xff]   ;;  %v4955_v7 = vld [vmem:[%s5237_s17 + $0x20] sm:$0xff]   ;;  %v4956_v8 = vld [vmem:[%s5237_s17 + $0x28] sm:$0xff]  }
  0x10   : > { %v4957_v9 = vld [vmem:[%s5237_s17 + $0x30] sm:$0xff]   ;;  %v4958_v10 = vld [vmem:[%s5237_s17 + $0x38] sm:$0xff]   ;;  %v4959_v11 = vld [vmem:[%s5237_s17 + $0x40] sm:$0xff]  }
  0x11   : > { %4521 = vmatpush3.bf16.msra.mxu0 %v4950_v1  ;;  %v4960_v12 = vld [vmem:[%s5237_s17 + $0x48] sm:$0xff]   ;;  %v4961_v13 = vld [vmem:[%s5237_s17 + $0x50] sm:$0xff]   ;;  %v4962_v14 = vld [vmem:[%s5237_s17 + $0x58] sm:$0xff]   ;;  %4589 = vmatpush3.bf16.msra.mxu1 %v4984_v22 }
  0x12   : > { %v4963_v15 = vld [vmem:[%s5237_s17 + $0x60] sm:$0xff]   ;;  %v4964_v16 = vld [vmem:[%s5237_s17 + $0x68] sm:$0xff]   ;;  %v4965_v17 = vld [vmem:[%s5237_s17 + $0x70] sm:$0xff]   ;;  %4590 = vmatprep.subr.bf16.mxu1 %v4985_v23  ;;  %4658 = vmatprep.subr.bf16.mxu0 %v4987_v38 }
  0x13   : > { %v4966_v18 = vld [vmem:[%s5237_s17 + $0x78] sm:$0xff]   ;;  %v4967_v19 = vld [vmem:[%s5237_s17 + $0x80] sm:$0xff]   ;;  %v4968_v20 = vld [vmem:[%s5237_s17 + $0x88] sm:$0xff]  }
  0x14   : > { %4523 = vmatmul.mubr.msk.bf16.vlgmr.msra.gmra.mxu0 %vm572_vm0, %v4952_v4  ;;  %v4969_v21 = vld [vmem:[%s5237_s17 + $0x90] sm:$0xff]   ;;  %v4970_v24 = vld [vmem:[%s5237_s17 + $0x98] sm:$0xff]   ;;  %v4971_v25 = vld [vmem:[%s5237_s17 + $0xa0] sm:$0xff]  }
  0x15   : > { %4526 = vmatprep.mubr.msk.bf16.mxu0 %vm572_vm0, %v4953_v5  ;;  %4591 = vmatpush3.bf16.msra.mxu1 %v4985_v23  ;;  %v4972_v27 = vld [vmem:[%s5237_s17 + $0xa8] sm:$0xff]   ;;  %v4973_v28 = vld [vmem:[%s5237_s17 + $0xb0] sm:$0xff]   ;;  %v4974_v29 = vld [vmem:[%s5237_s17 + $0xb8] sm:$0xff]  }
  0x16   : > { %4592 = vmatprep.subr.bf16.mxu1 %v4986_v26  ;;  %v4975_v30 = vld [vmem:[%s5237_s17 + $0xc0] sm:$0xff]   ;;  %v4976_v31 = vld [vmem:[%s5237_s17 + $0xc8] sm:$0xff]   ;;  %v4977_v32 = vld [vmem:[%s5237_s17 + $0xd0] sm:$0xff]   ;;  %4659 = vmatpush3.bf16.msra.mxu0 %v4987_v38 }
  0x17   : > { %v4978_v33 = vld [vmem:[%s5237_s17 + $0xd8] sm:$0xff]   ;;  %v4979_v34 = vld [vmem:[%s5237_s17 + $0xe0] sm:$0xff]   ;;  %v4980_v35 = vld [vmem:[%s5237_s17 + $0xe8] sm:$0xff]   ;;  %4660 = vmatprep.subr.bf16.mxu0 %v4988_v39 }
  0x18   : > { %v4981_v36 = vld [vmem:[%s5237_s17 + $0xf0] sm:$0xff]   ;;  %v4982_v37 = vld [vmem:[%s5237_s17 + $0xf8] sm:$0xff]   ;;  %v4990_v44 = vld [vmem:[%s6160_s5] sm:$0xff]   ;;  %s5914_s17 = scalar_lea.vmem %s6163_s8, %s4029_s14 }
  0x19   : > { %4593 = vmatpush3.bf16.msra.mxu1 %v4986_v26 }
  0x1a   : > { %4661 = vmatpush3.bf16.msra.mxu0 %v4988_v39 }
  0x1b   : > { %4662 = vmatprep.subr.bf16.mxu0 %v4989_v43 }
  0x1c   : > { %4527 = vmatmul.mubr.msk.bf16.gmra.mxu0 %vm572_vm0, %v4954_v6 }
  0x1d   : > { %4530 = vmatprep.mubr.msk.bf16.mxu0 %vm572_vm0, %v4955_v7 }
  0x1e   : > { %4663 = vmatpush3.bf16.msra.mxu0 %v4989_v43 }
  0x1f   : > { %4664 = vmatprep.subr.bf16.mxu0 %v4990_v44 }
  0x22   : > { %4665 = vmatpush3.bf16.msra.mxu0 %v4990_v44 }
  0x24   : > { %4531 = vmatmul.mubr.msk.bf16.gmra.mxu0 %vm572_vm0, %v4956_v8 }
  0x25   : > { %4534 = vmatprep.mubr.msk.bf16.mxu0 %vm572_vm0, %v4957_v9 }
  0x2c   : > { %4535 = vmatmul.mubr.msk.bf16.gmra.mxu0 %vm572_vm0, %v4958_v10 }
  0x2d   : > { %4538 = vmatprep.mubr.msk.bf16.mxu0 %vm572_vm0, %v4959_v11 }
  0x34   : > { %4539 = vmatmul.mubr.msk.bf16.gmra.mxu0 %vm572_vm0, %v4960_v12 }
  0x35   : > { %4542 = vmatprep.mubr.msk.bf16.mxu0 %vm572_vm0, %v4961_v13 }
  0x3c   : > { %4543 = vmatmul.mubr.msk.bf16.gmra.mxu0 %vm572_vm0, %v4962_v14 }
  0x3d   : > { %4546 = vmatprep.mubr.msk.bf16.mxu0 %vm572_vm0, %v4963_v15 }
  0x44   : > { %4547 = vmatmul.mubr.msk.bf16.gmra.mxu0 %vm572_vm0, %v4964_v16 }
  0x45   : > { %4550 = vmatprep.mubr.msk.bf16.mxu0 %vm572_vm0, %v4965_v17 }
  0x4c   : > { %4551 = vmatmul.mubr.msk.bf16.gmra.mxu0 %vm572_vm0, %v4966_v18 }
  0x4d   : > { %4554 = vmatprep.mubr.msk.bf16.mxu0 %vm572_vm0, %v4967_v19 }
  0x54   : > { %4555 = vmatmul.mubr.msk.bf16.gmra.mxu0 %vm572_vm0, %v4968_v20 }
  0x55   : > { %4558 = vmatprep.mubr.msk.bf16.mxu0 %vm572_vm0, %v4969_v21 }
  0x5c   : > { %4559 = vmatmul.mubr.msk.bf16.gmra.mxu0 %vm572_vm0, %v4970_v24 }
  0x5d   : > { %4562 = vmatprep.mubr.msk.bf16.mxu0 %vm572_vm0, %v4971_v25 }
  0x64   : > { %4563 = vmatmul.mubr.msk.bf16.gmra.mxu0 %vm572_vm0, %v4972_v27 }
  0x65   : > { %4566 = vmatprep.mubr.msk.bf16.mxu0 %vm572_vm0, %v4973_v28 }
  0x6c   : > { %4567 = vmatmul.mubr.msk.bf16.gmra.mxu0 %vm572_vm0, %v4974_v29 }
  0x6d   : > { %4570 = vmatprep.mubr.msk.bf16.mxu0 %vm572_vm0, %v4975_v30 }
  0x74   : > { %4571 = vmatmul.mubr.msk.bf16.gmra.mxu0 %vm572_vm0, %v4976_v31 }
  0x75   : > { %4574 = vmatprep.mubr.msk.bf16.mxu0 %vm572_vm0, %v4977_v32 }
  0x7c   : > { %4575 = vmatmul.mubr.msk.bf16.gmra.mxu0 %vm572_vm0, %v4978_v33 }
  0x7d   : > { %4578 = vmatprep.mubr.msk.bf16.mxu0 %vm572_vm0, %v4979_v34 }
  0x84   : > { %4579 = vmatmul.mubr.msk.bf16.gmra.mxu0 %vm572_vm0, %v4980_v35 }
  0x85   : > { %4582 = vmatprep.mubr.msk.bf16.mxu0 %vm572_vm0, %v4981_v36 }
  0x8c   : > { %4583 = vmatmul.mubr.msk.bf16.gmra.mxu0 %vm572_vm0, %v4982_v37 }
  0xd4   : > { %v4524_v40 = vpop.f32.mrf.mxu0 }
  0xd5   : > { %v960_v49 = vmax.f32 %v4524_v40, 0.0 }
  0xd6   : > { %v703_v41 = vpop.f32.mrf.mxu0 }
  0xd7   : > { %v958_v47 = vmax.f32 %v703_v41, 0.0 }
  0xd8   : > { %v4525_v42 = vpop.f32.mrf.mxu0 }
  0xd9   : > { %v961_v45 = vmax.f32 %v4525_v42, 0.0 }
  0xda   : > { %v706_v46 = vpop.f32.mrf.mxu0 }
  0xdb   : > { %v959_v48 = vmax.f32 %v706_v46, 0.0  ;;  %v1023_v52 = vpack.c.bf16 %v961_v45, %v960_v49 }
  0xdc   : > { %v4528_v50 = vpop.f32.mrf.mxu0 }
  0xdd   : > { %v1022_v51 = vpack.c.bf16 %v959_v48, %v958_v47  ;;  %v964_v59 = vmax.f32 %v4528_v50, 0.0 }
  0xde   : > { %v719_v53 = vpop.f32.mrf.mxu0 }
  0xdf   : > { %4594 = vmatprep.mubr.msk.bf16.mxu1 %vm1086_vm1, %v1022_v51  ;;  %v962_v57 = vmax.f32 %v719_v53, 0.0 }
  0xe0   : > { %v4529_v54 = vpop.f32.mrf.mxu0  ;;  %4595 = vmatmul.mubr.msk.bf16.vlgmr.msra.gmra.mxu1 %vm1086_vm1, %v1023_v52 }
  0xe1   : > { %v965_v55 = vmax.f32 %v4529_v54, 0.0 }
  0xe2   : > { %v722_v56 = vpop.f32.mrf.mxu0 }
  0xe3   : > { %v963_v58 = vmax.f32 %v722_v56, 0.0  ;;  %v1025_v62 = vpack.c.bf16 %v965_v55, %v964_v59 }
  0xe4   : > { %v4532_v60 = vpop.f32.mrf.mxu0 }
  0xe5   : > { %v1024_v61 = vpack.c.bf16 %v963_v58, %v962_v57  ;;  %v968_v5 = vmax.f32 %v4532_v60, 0.0 }
  0xe6   : > { %v735_v63 = vpop.f32.mrf.mxu0 }
  0xe7   : > { %4598 = vmatprep.mubr.msk.bf16.mxu1 %vm1086_vm1, %v1024_v61  ;;  %v966_v3 = vmax.f32 %v735_v63, 0.0 }
  0xe8   : > { %v4533_v0 = vpop.f32.mrf.mxu0  ;;  %4599 = vmatmul.mubr.msk.bf16.gmra.mxu1 %vm1086_vm1, %v1025_v62 }
  0xe9   : > { %v969_v1 = vmax.f32 %v4533_v0, 0.0 }
  0xea   : > { %v738_v2 = vpop.f32.mrf.mxu0 }
  0xeb   : > { %v967_v4 = vmax.f32 %v738_v2, 0.0  ;;  %v1027_v8 = vpack.c.bf16 %v969_v1, %v968_v5 }
  0xec   : > { %v4536_v6 = vpop.f32.mrf.mxu0 }
  0xed   : > { %v1026_v7 = vpack.c.bf16 %v967_v4, %v966_v3  ;;  %v972_v15 = vmax.f32 %v4536_v6, 0.0 }
  0xee   : > { %v751_v9 = vpop.f32.mrf.mxu0 }
  0xef   : > { %4602 = vmatprep.mubr.msk.bf16.mxu1 %vm1086_vm1, %v1026_v7  ;;  %v970_v13 = vmax.f32 %v751_v9, 0.0 }
  0xf0   : > { %v4537_v10 = vpop.f32.mrf.mxu0  ;;  %4603 = vmatmul.mubr.msk.bf16.gmra.mxu1 %vm1086_vm1, %v1027_v8 }
  0xf1   : > { %v973_v11 = vmax.f32 %v4537_v10, 0.0 }
  0xf2   : > { %v754_v12 = vpop.f32.mrf.mxu0 }
  0xf3   : > { %v971_v14 = vmax.f32 %v754_v12, 0.0  ;;  %v1029_v18 = vpack.c.bf16 %v973_v11, %v972_v15 }
  0xf4   : > { %v4540_v16 = vpop.f32.mrf.mxu0 }
  0xf5   : > { %v1028_v17 = vpack.c.bf16 %v971_v14, %v970_v13  ;;  %v976_v25 = vmax.f32 %v4540_v16, 0.0 }
  0xf6   : > { %v767_v19 = vpop.f32.mrf.mxu0 }
  0xf7   : > { %4606 = vmatprep.mubr.msk.bf16.mxu1 %vm1086_vm1, %v1028_v17  ;;  %v974_v23 = vmax.f32 %v767_v19, 0.0 }
  0xf8   : > { %v4541_v20 = vpop.f32.mrf.mxu0  ;;  %4607 = vmatmul.mubr.msk.bf16.gmra.mxu1 %vm1086_vm1, %v1029_v18 }
  0xf9   : > { %v977_v21 = vmax.f32 %v4541_v20, 0.0 }
  0xfa   : > { %v770_v22 = vpop.f32.mrf.mxu0 }
  0xfb   : > { %v975_v24 = vmax.f32 %v770_v22, 0.0  ;;  %v1031_v28 = vpack.c.bf16 %v977_v21, %v976_v25  ;;  %v4991_v21 = vld [vmem:[%s6161_s6] sm:$0xff]   ;;  %v5355_v22 = vld [vmem:[%s6159_s4 + $0x18] sm:$0xff]  }
  0xfc   : > { %v4544_v26 = vpop.f32.mrf.mxu0  ;;  %4730 = vmatprep.subr.bf16.mxu1 %v4991_v21  ;;  %4796 = vmatprep.subr.bf16.mxu0 %v5355_v22 }
  0xfd   : > { %v1030_v27 = vpack.c.bf16 %v975_v24, %v974_v23  ;;  %v980_v35 = vmax.f32 %v4544_v26, 0.0  ;;  %4731 = vmatpush3.bf16.msra.mxu1 %v4991_v21 }
  0xfe   : > { %v783_v29 = vpop.f32.mrf.mxu0 }
  0xff   : > { %4610 = vmatprep.mubr.msk.bf16.mxu1 %vm1086_vm1, %v1030_v27  ;;  %v978_v33 = vmax.f32 %v783_v29, 0.0 }
 0x100   : > { %v4545_v30 = vpop.f32.mrf.mxu0  ;;  %4611 = vmatmul.mubr.msk.bf16.gmra.mxu1 %vm1086_vm1, %v1031_v28 }
 0x101   : > { %v981_v31 = vmax.f32 %v4545_v30, 0.0 }
 0x102   : > { %v786_v32 = vpop.f32.mrf.mxu0 }
 0x103   : > { %v979_v34 = vmax.f32 %v786_v32, 0.0  ;;  %v1033_v38 = vpack.c.bf16 %v981_v31, %v980_v35 }
 0x104   : > { %v4548_v36 = vpop.f32.mrf.mxu0 }
 0x105   : > { %v1032_v37 = vpack.c.bf16 %v979_v34, %v978_v33  ;;  %v984_v45 = vmax.f32 %v4548_v36, 0.0 }
 0x106   : > { %v799_v39 = vpop.f32.mrf.mxu0 }
 0x107   : > { %4614 = vmatprep.mubr.msk.bf16.mxu1 %vm1086_vm1, %v1032_v37  ;;  %v982_v43 = vmax.f32 %v799_v39, 0.0 }
 0x108   : > { %v4549_v40 = vpop.f32.mrf.mxu0  ;;  %4615 = vmatmul.mubr.msk.bf16.gmra.mxu1 %vm1086_vm1, %v1033_v38 }
 0x109   : > { %v985_v41 = vmax.f32 %v4549_v40, 0.0 }
 0x10a   : > { %v802_v42 = vpop.f32.mrf.mxu0 }
 0x10b   : > { %v983_v44 = vmax.f32 %v802_v42, 0.0  ;;  %v1035_v48 = vpack.c.bf16 %v985_v41, %v984_v45 }
 0x10c   : > { %v4552_v46 = vpop.f32.mrf.mxu0 }
 0x10d   : > { %v1034_v47 = vpack.c.bf16 %v983_v44, %v982_v43  ;;  %v988_v55 = vmax.f32 %v4552_v46, 0.0 }
 0x10e   : > { %v815_v49 = vpop.f32.mrf.mxu0 }
 0x10f   : > { %4618 = vmatprep.mubr.msk.bf16.mxu1 %vm1086_vm1, %v1034_v47  ;;  %v986_v53 = vmax.f32 %v815_v49, 0.0 }
 0x110   : > { %v4553_v50 = vpop.f32.mrf.mxu0  ;;  %4619 = vmatmul.mubr.msk.bf16.gmra.mxu1 %vm1086_vm1, %v1035_v48 }
 0x111   : > { %v989_v51 = vmax.f32 %v4553_v50, 0.0 }
 0x112   : > { %v818_v52 = vpop.f32.mrf.mxu0 }
 0x113   : > { %v987_v54 = vmax.f32 %v818_v52, 0.0  ;;  %v1037_v58 = vpack.c.bf16 %v989_v51, %v988_v55 }
 0x114   : > { %v4556_v56 = vpop.f32.mrf.mxu0 }
 0x115   : > { %v1036_v57 = vpack.c.bf16 %v987_v54, %v986_v53  ;;  %v992_v1 = vmax.f32 %v4556_v56, 0.0 }
 0x116   : > { %v831_v59 = vpop.f32.mrf.mxu0 }
 0x117   : > { %4622 = vmatprep.mubr.msk.bf16.mxu1 %vm1086_vm1, %v1036_v57  ;;  %v990_v63 = vmax.f32 %v831_v59, 0.0 }
 0x118   : > { %v4557_v60 = vpop.f32.mrf.mxu0  ;;  %4623 = vmatmul.mubr.msk.bf16.gmra.mxu1 %vm1086_vm1, %v1037_v58 }
 0x119   : > { %v993_v61 = vmax.f32 %v4557_v60, 0.0 }
 0x11a   : > { %v834_v62 = vpop.f32.mrf.mxu0 }
 0x11b   : > { %v991_v0 = vmax.f32 %v834_v62, 0.0  ;;  %v1039_v4 = vpack.c.bf16 %v993_v61, %v992_v1 }
 0x11c   : > { %v4560_v2 = vpop.f32.mrf.mxu0 }
 0x11d   : > { %v1038_v3 = vpack.c.bf16 %v991_v0, %v990_v63  ;;  %v996_v11 = vmax.f32 %v4560_v2, 0.0 }
 0x11e   : > { %v847_v5 = vpop.f32.mrf.mxu0 }
 0x11f   : > { %4626 = vmatprep.mubr.msk.bf16.mxu1 %vm1086_vm1, %v1038_v3  ;;  %v994_v9 = vmax.f32 %v847_v5, 0.0 }
 0x120   : > { %v4561_v6 = vpop.f32.mrf.mxu0  ;;  %4627 = vmatmul.mubr.msk.bf16.gmra.mxu1 %vm1086_vm1, %v1039_v4 }
 0x121   : > { %v997_v7 = vmax.f32 %v4561_v6, 0.0 }
 0x122   : > { %v850_v8 = vpop.f32.mrf.mxu0 }
 0x123   : > { %v995_v10 = vmax.f32 %v850_v8, 0.0  ;;  %v1041_v14 = vpack.c.bf16 %v997_v7, %v996_v11 }
 0x124   : > { %v4564_v12 = vpop.f32.mrf.mxu0 }
 0x125   : > { %v1040_v13 = vpack.c.bf16 %v995_v10, %v994_v9  ;;  %v1000_v23 = vmax.f32 %v4564_v12, 0.0 }
 0x126   : > { %v863_v15 = vpop.f32.mrf.mxu0 }
 0x127   : > { %4630 = vmatprep.mubr.msk.bf16.mxu1 %vm1086_vm1, %v1040_v13  ;;  %v998_v19 = vmax.f32 %v863_v15, 0.0 }
 0x128   : > { %v4565_v16 = vpop.f32.mrf.mxu0  ;;  %4631 = vmatmul.mubr.msk.bf16.gmra.mxu1 %vm1086_vm1, %v1041_v14  ;;  %v4996_v14 = vld [vmem:[%s5262_s20] sm:$0xff]  }
 0x129   : > { %v1001_v17 = vmax.f32 %v4565_v16, 0.0  ;;  %v4997_v16 = vld [vmem:[%s5262_s20 + $0x8] sm:$0xff]  }
 0x12a   : > { %v866_v18 = vpop.f32.mrf.mxu0 }
 0x12b   : > { %v999_v20 = vmax.f32 %v866_v18, 0.0  ;;  %v1043_v26 = vpack.c.bf16 %v1001_v17, %v1000_v23 }
 0x12c   : > { %v4568_v24 = vpop.f32.mrf.mxu0 }
 0x12d   : > { %v1042_v25 = vpack.c.bf16 %v999_v20, %v998_v19  ;;  %v1004_v33 = vmax.f32 %v4568_v24, 0.0 }
 0x12e   : > { %v879_v27 = vpop.f32.mrf.mxu0 }
 0x12f   : > { %4634 = vmatprep.mubr.msk.bf16.mxu1 %vm1086_vm1, %v1042_v25  ;;  %v1002_v31 = vmax.f32 %v879_v27, 0.0  ;;  %v4993_v27 = vld [vmem:[%s6159_s4 + $0x10] sm:$0xff]  }
 0x130   : > { %v4569_v28 = vpop.f32.mrf.mxu0  ;;  %4635 = vmatmul.mubr.msk.bf16.gmra.mxu1 %vm1086_vm1, %v1043_v26 }
 0x131   : > { %v1005_v29 = vmax.f32 %v4569_v28, 0.0  ;;  %v4998_v28 = vld [vmem:[%s5262_s20 + $0x10] sm:$0xff]  }
 0x132   : > { %v882_v30 = vpop.f32.mrf.mxu0 }
 0x133   : > { %v1003_v32 = vmax.f32 %v882_v30, 0.0  ;;  %v1045_v36 = vpack.c.bf16 %v1005_v29, %v1004_v33  ;;  %v4999_v30 = vld [vmem:[%s5262_s20 + $0x18] sm:$0xff]   ;;  %v4994_v33 = vld [vmem:[%s6159_s4 + $0x8] sm:$0xff]  }
 0x134   : > { %v4572_v34 = vpop.f32.mrf.mxu0 }
 0x135   : > { %v1044_v35 = vpack.c.bf16 %v1003_v32, %v1002_v31  ;;  %v1008_v43 = vmax.f32 %v4572_v34, 0.0 }
 0x136   : > { %v895_v37 = vpop.f32.mrf.mxu0 }
 0x137   : > { %4638 = vmatprep.mubr.msk.bf16.mxu1 %vm1086_vm1, %v1044_v35  ;;  %v1006_v41 = vmax.f32 %v895_v37, 0.0 }
 0x138   : > { %v4573_v38 = vpop.f32.mrf.mxu0  ;;  %4639 = vmatmul.mubr.msk.bf16.gmra.mxu1 %vm1086_vm1, %v1045_v36 }
 0x139   : > { %v1009_v39 = vmax.f32 %v4573_v38, 0.0 }
 0x13a   : > { %v898_v40 = vpop.f32.mrf.mxu0 }
 0x13b   : > { %v1007_v42 = vmax.f32 %v898_v40, 0.0  ;;  %v1047_v46 = vpack.c.bf16 %v1009_v39, %v1008_v43  ;;  %v4995_v40 = vld [vmem:[%s6159_s4] sm:$0xff]   ;;  %v5001_v43 = vld [vmem:[%s5262_s20 + $0x28] sm:$0xff]  }
 0x13c   : > { %v4576_v44 = vpop.f32.mrf.mxu0 }
 0x13d   : > { %v1046_v45 = vpack.c.bf16 %v1007_v42, %v1006_v41  ;;  %v1012_v53 = vmax.f32 %v4576_v44, 0.0  ;;  %v5000_v41 = vld [vmem:[%s5262_s20 + $0x20] sm:$0xff]  }
 0x13e   : > { %v911_v47 = vpop.f32.mrf.mxu0 }
 0x13f   : > { %4642 = vmatprep.mubr.msk.bf16.mxu1 %vm1086_vm1, %v1046_v45  ;;  %v1010_v51 = vmax.f32 %v911_v47, 0.0 }
 0x140   : > { %v4577_v48 = vpop.f32.mrf.mxu0  ;;  %4643 = vmatmul.mubr.msk.bf16.gmra.mxu1 %vm1086_vm1, %v1047_v46 }
 0x141   : > { %v1013_v49 = vmax.f32 %v4577_v48, 0.0 }
 0x142   : > { %v914_v50 = vpop.f32.mrf.mxu0 }
 0x143   : > { %v1011_v52 = vmax.f32 %v914_v50, 0.0  ;;  %v1049_v56 = vpack.c.bf16 %v1013_v49, %v1012_v53  ;;  %v5002_v53 = vld [vmem:[%s5262_s20 + $0x30] sm:$0xff]  }
 0x144   : > { %v4580_v54 = vpop.f32.mrf.mxu0 }
 0x145   : > { %v1048_v55 = vpack.c.bf16 %v1011_v52, %v1010_v51  ;;  %v1016_v63 = vmax.f32 %v4580_v54, 0.0 }
 0x146   : > { %v927_v57 = vpop.f32.mrf.mxu0 }
 0x147   : > { %4646 = vmatprep.mubr.msk.bf16.mxu1 %vm1086_vm1, %v1048_v55  ;;  %v1014_v61 = vmax.f32 %v927_v57, 0.0  ;;  %v5003_v55 = vld [vmem:[%s5262_s20 + $0x38] sm:$0xff]  }
 0x148   : > { %v4581_v58 = vpop.f32.mrf.mxu0  ;;  %4647 = vmatmul.mubr.msk.bf16.gmra.mxu1 %vm1086_vm1, %v1049_v56 }
 0x149   : > { %v1017_v59 = vmax.f32 %v4581_v58, 0.0 }
 0x14a   : > { %v930_v60 = vpop.f32.mrf.mxu0 }
 0x14b   : > { %v1015_v62 = vmax.f32 %v930_v60, 0.0  ;;  %v1051_v2 = vpack.c.bf16 %v1017_v59, %v1016_v63 }
 0x14c   : > { %v4584_v0 = vpop.f32.mrf.mxu0 }
 0x14d   : > { %v1050_v1 = vpack.c.bf16 %v1015_v62, %v1014_v61  ;;  %v1020_v9 = vmax.f32 %v4584_v0, 0.0 }
 0x14e   : > { %v943_v3 = vpop.f32.mrf.mxu0 }
 0x14f   : > { %4650 = vmatprep.mubr.msk.bf16.mxu1 %vm1086_vm1, %v1050_v1  ;;  %v1018_v7 = vmax.f32 %v943_v3, 0.0  ;;  %v5004_v1 = vld [vmem:[%s5262_s20 + $0x40] sm:$0xff]   ;;  %v5005_v3 = vld [vmem:[%s5262_s20 + $0x48] sm:$0xff]  }
 0x150   : > { %v4585_v4 = vpop.f32.mrf.mxu0  ;;  %4651 = vmatmul.mubr.msk.bf16.gmra.mxu1 %vm1086_vm1, %v1051_v2 }
 0x151   : > { %v1021_v5 = vmax.f32 %v4585_v4, 0.0 }
 0x152   : > { %v946_v6 = vpop.f32.mrf.mxu0 }
 0x153   : > { %v1019_v8 = vmax.f32 %v946_v6, 0.0  ;;  %v1053_v11 = vpack.c.bf16 %v1021_v5, %v1020_v9 }
 0x155   : > { %v1052_v10 = vpack.c.bf16 %v1019_v8, %v1018_v7 }
 0x157   : > { %4654 = vmatprep.mubr.msk.bf16.mxu1 %vm1086_vm1, %v1052_v10 }
 0x158   : > { %4655 = vmatmul.mubr.msk.bf16.gmra.mxu1 %vm1086_vm1, %v1053_v11 }
 0x159   : > { %4732 = vmatprep.mubr.msk.bf16.mxu1 %vm2225_vm2, %v4996_v14 }
 0x160   : > { %4733 = vmatmul.mubr.msk.bf16.vlgmr.msra.gmra.mxu1 %vm2225_vm2, %v4997_v16 }
 0x161   : > { %4736 = vmatprep.mubr.msk.bf16.mxu1 %vm2225_vm2, %v4998_v28  ;;  %v5008_v28 = vld [vmem:[%s5262_s20 + $0x60] sm:$0xff]  }
 0x168   : > { %4737 = vmatmul.mubr.msk.bf16.gmra.mxu1 %vm2225_vm2, %v4999_v30  ;;  %v5009_v30 = vld [vmem:[%s5262_s20 + $0x68] sm:$0xff]  }
 0x169   : > { %4740 = vmatprep.mubr.msk.bf16.mxu1 %vm2225_vm2, %v5000_v41  ;;  %v5010_v41 = vld [vmem:[%s5262_s20 + $0x70] sm:$0xff]  }
 0x170   : > { %4741 = vmatmul.mubr.msk.bf16.gmra.mxu1 %vm2225_vm2, %v5001_v43  ;;  %v5011_v43 = vld [vmem:[%s5262_s20 + $0x78] sm:$0xff]  }
 0x171   : > { %4744 = vmatprep.mubr.msk.bf16.mxu1 %vm2225_vm2, %v5002_v53 }
 0x178   : > { %4745 = vmatmul.mubr.msk.bf16.gmra.mxu1 %vm2225_vm2, %v5003_v55  ;;  %v5012_v55 = vld [vmem:[%s5262_s20 + $0x80] sm:$0xff]  }
 0x179   : > { %4748 = vmatprep.mubr.msk.bf16.mxu1 %vm2225_vm2, %v5004_v1 }
 0x180   : > { %4749 = vmatmul.mubr.msk.bf16.gmra.mxu1 %vm2225_vm2, %v5005_v3 }
 0x1a0   : > { %v4596_v12 = vpop.f32.mrf.mxu1 }
 0x1a1   : > { %v1474_v21 = vmax.f32 %v4596_v12, 0.0 }
 0x1a2   : > { %v1217_v13 = vpop.f32.mrf.mxu1 }
 0x1a3   : > { %v1472_v19 = vmax.f32 %v1217_v13, 0.0  ;;  %v5006_v13 = vld [vmem:[%s5262_s20 + $0x50] sm:$0xff]  }
 0x1a4   : > { %v4597_v15 = vpop.f32.mrf.mxu1  ;;  %4752 = vmatprep.mubr.msk.bf16.mxu1 %vm2225_vm2, %v5006_v13 }
 0x1a5   : > { %v1475_v17 = vmax.f32 %v4597_v15, 0.0  ;;  %v5007_v15 = vld [vmem:[%s5262_s20 + $0x58] sm:$0xff]  }
 0x1a6   : > { %v1220_v18 = vpop.f32.mrf.mxu1  ;;  %4753 = vmatmul.mubr.msk.bf16.gmra.mxu1 %vm2225_vm2, %v5007_v15 }
 0x1a7   : > { %v1473_v20 = vmax.f32 %v1220_v18, 0.0  ;;  %v5376_v25 = vpack.c.bf16 %v1475_v17, %v1474_v21  ;;  %4756 = vmatprep.mubr.msk.bf16.mxu1 %vm2225_vm2, %v5008_v28 }
 0x1a8   : > { %v4600_v23 = vpop.f32.mrf.mxu1 }
 0x1a9   : > { %v5374_v24 = vpack.c.bf16 %v1473_v20, %v1472_v19  ;;  %v1478_v36 = vmax.f32 %v4600_v23, 0.0 }
 0x1aa   : > { %v1233_v26 = vpop.f32.mrf.mxu1 }
 0x1ab   : > { %4666 = vmatprep.mubr.msk.bf16.mxu0 %vm1086_vm1, %v5374_v24  ;;  %v1476_v34 = vmax.f32 %v1233_v26, 0.0 }
 0x1ac   : > { %v4601_v29 = vpop.f32.mrf.mxu1  ;;  %4667 = vmatmul.mubr.msk.bf16.vlgmr.msra.gmra.mxu0 %vm1086_vm1, %v5376_v25 }
 0x1ad   : > { %4797 = vmatpush3.bf16.msra.mxu0 %v5355_v22  ;;  %v1479_v31 = vmax.f32 %v4601_v29, 0.0 }
 0x1ae   : > { %v1236_v32 = vpop.f32.mrf.mxu1  ;;  %4798 = vmatprep.subr.bf16.mxu0 %v4993_v27  ;;  %4757 = vmatmul.mubr.msk.bf16.gmra.mxu1 %vm2225_vm2, %v5009_v30 }
 0x1af   : > { %v1477_v35 = vmax.f32 %v1236_v32, 0.0  ;;  %v5395_v22 = vpack.c.bf16 %v1479_v31, %v1478_v36  ;;  %4760 = vmatprep.mubr.msk.bf16.mxu1 %vm2225_vm2, %v5010_v41 }
 0x1b0   : > { %v4604_v37 = vpop.f32.mrf.mxu1 }
 0x1b1   : > { %v5393_v38 = vpack.c.bf16 %v1477_v35, %v1476_v34  ;;  %4799 = vmatpush3.bf16.msra.mxu0 %v4993_v27  ;;  %v1482_v48 = vmax.f32 %v4604_v37, 0.0 }
 0x1b2   : > { %v1249_v39 = vpop.f32.mrf.mxu1  ;;  %4800 = vmatprep.subr.bf16.mxu0 %v4994_v33 }
 0x1b3   : > { %4670 = vmatprep.mubr.msk.bf16.mxu0 %vm1086_vm1, %v5393_v38  ;;  %v1480_v46 = vmax.f32 %v1249_v39, 0.0 }
 0x1b4   : > { %v4605_v42 = vpop.f32.mrf.mxu1  ;;  %4671 = vmatmul.mubr.msk.bf16.gmra.mxu0 %vm1086_vm1, %v5395_v22 }
 0x1b5   : > { %4801 = vmatpush3.bf16.msra.mxu0 %v4994_v33  ;;  %v1483_v44 = vmax.f32 %v4605_v42, 0.0 }
 0x1b6   : > { %v1252_v45 = vpop.f32.mrf.mxu1  ;;  %4802 = vmatprep.subr.bf16.mxu0 %v4995_v40  ;;  %4761 = vmatmul.mubr.msk.bf16.gmra.mxu1 %vm2225_vm2, %v5011_v43 }
 0x1b7   : > { %v1481_v47 = vmax.f32 %v1252_v45, 0.0  ;;  %v5410_v51 = vpack.c.bf16 %v1483_v44, %v1482_v48  ;;  %4764 = vmatprep.mubr.msk.bf16.mxu1 %vm2225_vm2, %v5012_v55 }
 0x1b8   : > { %v4608_v49 = vpop.f32.mrf.mxu1 }
 0x1b9   : > { %v5408_v50 = vpack.c.bf16 %v1481_v47, %v1480_v46  ;;  %4803 = vmatpush3.bf16.msra.mxu0 %v4995_v40  ;;  %v1486_v60 = vmax.f32 %v4608_v49, 0.0 }
 0x1ba   : > { %v1265_v52 = vpop.f32.mrf.mxu1 }
 0x1bb   : > { %4674 = vmatprep.mubr.msk.bf16.mxu0 %vm1086_vm1, %v5408_v50  ;;  %v1484_v58 = vmax.f32 %v1265_v52, 0.0 }
 0x1bc   : > { %v4609_v54 = vpop.f32.mrf.mxu1  ;;  %4675 = vmatmul.mubr.msk.bf16.gmra.mxu0 %vm1086_vm1, %v5410_v51 }
 0x1bd   : > { %v1487_v56 = vmax.f32 %v4609_v54, 0.0 }
 0x1be   : > { %v1268_v57 = vpop.f32.mrf.mxu1 }
 0x1bf   : > { %v1485_v59 = vmax.f32 %v1268_v57, 0.0  ;;  %v5422_v63 = vpack.c.bf16 %v1487_v56, %v1486_v60  ;;  %v5013_v57 = vld [vmem:[%s5262_s20 + $0x88] sm:$0xff]  }
 0x1c0   : > { %v4612_v61 = vpop.f32.mrf.mxu1  ;;  %4765 = vmatmul.mubr.msk.bf16.gmra.mxu1 %vm2225_vm2, %v5013_v57 }
 0x1c1   : > { %v5420_v62 = vpack.c.bf16 %v1485_v59, %v1484_v58  ;;  %v1490_v8 = vmax.f32 %v4612_v61, 0.0 }
 0x1c2   : > { %v1281_v0 = vpop.f32.mrf.mxu1 }
 0x1c3   : > { %4678 = vmatprep.mubr.msk.bf16.mxu0 %vm1086_vm1, %v5420_v62  ;;  %v1488_v6 = vmax.f32 %v1281_v0, 0.0 }
 0x1c4   : > { %v4613_v2 = vpop.f32.mrf.mxu1  ;;  %4679 = vmatmul.mubr.msk.bf16.gmra.mxu0 %vm1086_vm1, %v5422_v63 }
 0x1c5   : > { %v1491_v4 = vmax.f32 %v4613_v2, 0.0 }
 0x1c6   : > { %v1284_v5 = vpop.f32.mrf.mxu1 }
 0x1c7   : > { %v1489_v7 = vmax.f32 %v1284_v5, 0.0  ;;  %v5434_v11 = vpack.c.bf16 %v1491_v4, %v1490_v8  ;;  %v5014_v5 = vld [vmem:[%s5262_s20 + $0x90] sm:$0xff]  }
 0x1c8   : > { %v4616_v9 = vpop.f32.mrf.mxu1  ;;  %4768 = vmatprep.mubr.msk.bf16.mxu1 %vm2225_vm2, %v5014_v5 }
 0x1c9   : > { %v5432_v10 = vpack.c.bf16 %v1489_v7, %v1488_v6  ;;  %v1494_v20 = vmax.f32 %v4616_v9, 0.0  ;;  %v5015_v7 = vld [vmem:[%s5262_s20 + $0x98] sm:$0xff]  }
 0x1ca   : > { %v1297_v12 = vpop.f32.mrf.mxu1  ;;  %4769 = vmatmul.mubr.msk.bf16.gmra.mxu1 %vm2225_vm2, %v5015_v7 }
 0x1cb   : > { %4682 = vmatprep.mubr.msk.bf16.mxu0 %vm1086_vm1, %v5432_v10  ;;  %v1492_v18 = vmax.f32 %v1297_v12, 0.0 }
 0x1cc   : > { %v4617_v14 = vpop.f32.mrf.mxu1  ;;  %4683 = vmatmul.mubr.msk.bf16.gmra.mxu0 %vm1086_vm1, %v5434_v11 }
 0x1cd   : > { %v1495_v16 = vmax.f32 %v4617_v14, 0.0 }
 0x1ce   : > { %v1300_v17 = vpop.f32.mrf.mxu1 }
 0x1cf   : > { %v1493_v19 = vmax.f32 %v1300_v17, 0.0  ;;  %v5446_v26 = vpack.c.bf16 %v1495_v16, %v1494_v20 }
 0x1d0   : > { %v4620_v21 = vpop.f32.mrf.mxu1 }
 0x1d1   : > { %v5444_v23 = vpack.c.bf16 %v1493_v19, %v1492_v18  ;;  %v1498_v35 = vmax.f32 %v4620_v21, 0.0  ;;  %v5016_v19 = vld [vmem:[%s5262_s20 + $0xa0] sm:$0xff]   ;;  %v5017_v21 = vld [vmem:[%s5262_s20 + $0xa8] sm:$0xff]  }
 0x1d2   : > { %v1313_v27 = vpop.f32.mrf.mxu1  ;;  %4772 = vmatprep.mubr.msk.bf16.mxu1 %vm2225_vm2, %v5016_v19 }
 0x1d3   : > { %4686 = vmatprep.mubr.msk.bf16.mxu0 %vm1086_vm1, %v5444_v23  ;;  %v1496_v33 = vmax.f32 %v1313_v27, 0.0  ;;  %4773 = vmatmul.mubr.msk.bf16.gmra.mxu1 %vm2225_vm2, %v5017_v21 }
 0x1d4   : > { %v4621_v29 = vpop.f32.mrf.mxu1  ;;  %4687 = vmatmul.mubr.msk.bf16.gmra.mxu0 %vm1086_vm1, %v5446_v26 }
 0x1d5   : > { %v1499_v31 = vmax.f32 %v4621_v29, 0.0 }
 0x1d6   : > { %v1316_v32 = vpop.f32.mrf.mxu1 }
 0x1d7   : > { %v1497_v34 = vmax.f32 %v1316_v32, 0.0  ;;  %v5458_v39 = vpack.c.bf16 %v1499_v31, %v1498_v35 }
 0x1d8   : > { %v4624_v36 = vpop.f32.mrf.mxu1 }
 0x1d9   : > { %v5456_v37 = vpack.c.bf16 %v1497_v34, %v1496_v33  ;;  %v1502_v48 = vmax.f32 %v4624_v36, 0.0  ;;  %v5018_v36 = vld [vmem:[%s6162_s7 + $0x18] sm:$0xff]  }
 0x1da   : > { %v1329_v40 = vpop.f32.mrf.mxu1  ;;  %4868 = vmatprep.subr.bf16.mxu1 %v5018_v36 }
 0x1db   : > { %4690 = vmatprep.mubr.msk.bf16.mxu0 %vm1086_vm1, %v5456_v37  ;;  %v1500_v46 = vmax.f32 %v1329_v40, 0.0  ;;  %v5019_v40 = vld [vmem:[%s5262_s20 + $0xb0] sm:$0xff]   ;;  %4869 = vmatpush3.bf16.msra.mxu1 %v5018_v36 }
 0x1dc   : > { %v4625_v42 = vpop.f32.mrf.mxu1  ;;  %4691 = vmatmul.mubr.msk.bf16.gmra.mxu0 %vm1086_vm1, %v5458_v39  ;;  %4776 = vmatprep.mubr.msk.bf16.mxu1 %vm2225_vm2, %v5019_v40 }
 0x1dd   : > { %v1503_v44 = vmax.f32 %v4625_v42, 0.0  ;;  %v5020_v42 = vld [vmem:[%s5262_s20 + $0xb8] sm:$0xff]  }
 0x1de   : > { %v1332_v45 = vpop.f32.mrf.mxu1  ;;  %4777 = vmatmul.mubr.msk.bf16.gmra.mxu1 %vm2225_vm2, %v5020_v42 }
 0x1df   : > { %v1501_v47 = vmax.f32 %v1332_v45, 0.0  ;;  %v5470_v53 = vpack.c.bf16 %v1503_v44, %v1502_v48 }
 0x1e0   : > { %v4628_v49 = vpop.f32.mrf.mxu1 }
 0x1e1   : > { %v5468_v52 = vpack.c.bf16 %v1501_v47, %v1500_v46  ;;  %v1506_v0 = vmax.f32 %v4628_v49, 0.0 }
 0x1e2   : > { %v1345_v54 = vpop.f32.mrf.mxu1 }
 0x1e3   : > { %4694 = vmatprep.mubr.msk.bf16.mxu0 %vm1086_vm1, %v5468_v52  ;;  %v1504_v60 = vmax.f32 %v1345_v54, 0.0 }
 0x1e4   : > { %v4629_v56 = vpop.f32.mrf.mxu1  ;;  %4695 = vmatmul.mubr.msk.bf16.gmra.mxu0 %vm1086_vm1, %v5470_v53 }
 0x1e5   : > { %v1507_v58 = vmax.f32 %v4629_v56, 0.0  ;;  %v5021_v56 = vld [vmem:[%s5262_s20 + $0xc0] sm:$0xff]  }
 0x1e6   : > { %v1348_v59 = vpop.f32.mrf.mxu1  ;;  %4780 = vmatprep.mubr.msk.bf16.mxu1 %vm2225_vm2, %v5021_v56 }
 0x1e7   : > { %v1505_v61 = vmax.f32 %v1348_v59, 0.0  ;;  %v5482_v3 = vpack.c.bf16 %v1507_v58, %v1506_v0  ;;  %v5022_v58 = vld [vmem:[%s5262_s20 + $0xc8] sm:$0xff]  }
 0x1e8   : > { %v4632_v1 = vpop.f32.mrf.mxu1  ;;  %4781 = vmatmul.mubr.msk.bf16.gmra.mxu1 %vm2225_vm2, %v5022_v58 }
 0x1e9   : > { %v5480_v2 = vpack.c.bf16 %v1505_v61, %v1504_v60  ;;  %v1510_v14 = vmax.f32 %v4632_v1, 0.0 }
 0x1ea   : > { %v1361_v4 = vpop.f32.mrf.mxu1 }
 0x1eb   : > { %4698 = vmatprep.mubr.msk.bf16.mxu0 %vm1086_vm1, %v5480_v2  ;;  %v1508_v12 = vmax.f32 %v1361_v4, 0.0 }
 0x1ec   : > { %v4633_v6 = vpop.f32.mrf.mxu1  ;;  %4699 = vmatmul.mubr.msk.bf16.gmra.mxu0 %vm1086_vm1, %v5482_v3 }
 0x1ed   : > { %v1511_v8 = vmax.f32 %v4633_v6, 0.0 }
 0x1ee   : > { %v1364_v9 = vpop.f32.mrf.mxu1 }
 0x1ef   : > { %v1509_v13 = vmax.f32 %v1364_v9, 0.0  ;;  %v5494_v17 = vpack.c.bf16 %v1511_v8, %v1510_v14  ;;  %v5023_v8 = vld [vmem:[%s5262_s20 + $0xd0] sm:$0xff]  }
 0x1f0   : > { %v4636_v15 = vpop.f32.mrf.mxu1  ;;  %4784 = vmatprep.mubr.msk.bf16.mxu1 %vm2225_vm2, %v5023_v8 }
 0x1f1   : > { %v5492_v16 = vpack.c.bf16 %v1509_v13, %v1508_v12  ;;  %v1514_v31 = vmax.f32 %v4636_v15, 0.0  ;;  %v5024_v12 = vld [vmem:[%s5262_s20 + $0xd8] sm:$0xff]  }
 0x1f2   : > { %v1377_v18 = vpop.f32.mrf.mxu1  ;;  %4785 = vmatmul.mubr.msk.bf16.gmra.mxu1 %vm2225_vm2, %v5024_v12 }
 0x1f3   : > { %4702 = vmatprep.mubr.msk.bf16.mxu0 %vm1086_vm1, %v5492_v16  ;;  %v1512_v29 = vmax.f32 %v1377_v18, 0.0 }
 0x1f4   : > { %v4637_v20 = vpop.f32.mrf.mxu1  ;;  %4703 = vmatmul.mubr.msk.bf16.gmra.mxu0 %vm1086_vm1, %v5494_v17 }
 0x1f5   : > { %v1515_v27 = vmax.f32 %v4637_v20, 0.0 }
 0x1f6   : > { %v1380_v28 = vpop.f32.mrf.mxu1 }
 0x1f7   : > { %v1513_v30 = vmax.f32 %v1380_v28, 0.0  ;;  %v5506_v34 = vpack.c.bf16 %v1515_v27, %v1514_v31  ;;  %v5026_v31 = vld [vmem:[%s5262_s20 + $0xe8] sm:$0xff]  }
 0x1f8   : > { %v4640_v32 = vpop.f32.mrf.mxu1 }
 0x1f9   : > { %v5504_v33 = vpack.c.bf16 %v1513_v30, %v1512_v29  ;;  %v1518_v47 = vmax.f32 %v4640_v32, 0.0  ;;  %v5025_v29 = vld [vmem:[%s5262_s20 + $0xe0] sm:$0xff]  }
 0x1fa   : > { %v1393_v35 = vpop.f32.mrf.mxu1  ;;  %4788 = vmatprep.mubr.msk.bf16.mxu1 %vm2225_vm2, %v5025_v29 }
 0x1fb   : > { %4706 = vmatprep.mubr.msk.bf16.mxu0 %vm1086_vm1, %v5504_v33  ;;  %v1516_v45 = vmax.f32 %v1393_v35, 0.0  ;;  %4789 = vmatmul.mubr.msk.bf16.gmra.mxu1 %vm2225_vm2, %v5026_v31 }
 0x1fc   : > { %v4641_v41 = vpop.f32.mrf.mxu1  ;;  %4707 = vmatmul.mubr.msk.bf16.gmra.mxu0 %vm1086_vm1, %v5506_v34 }
 0x1fd   : > { %v1519_v43 = vmax.f32 %v4641_v41, 0.0 }
 0x1fe   : > { %v1396_v44 = vpop.f32.mrf.mxu1 }
 0x1ff   : > { %v1517_v46 = vmax.f32 %v1396_v44, 0.0  ;;  %v5521_v54 = vpack.c.bf16 %v1519_v43, %v1518_v47  ;;  %v5028_v47 = vld [vmem:[%s5262_s20 + $0xf0] sm:$0xff]  }
 0x200   : > { %v4644_v48 = vpop.f32.mrf.mxu1  ;;  %4792 = vmatprep.mubr.msk.bf16.mxu1 %vm2225_vm2, %v5028_v47 }
 0x201   : > { %v5519_v49 = vpack.c.bf16 %v1517_v46, %v1516_v45  ;;  %v1522_v1 = vmax.f32 %v4644_v48, 0.0  ;;  %v5027_v46 = vld [vmem:[%s6162_s7 + $0x10] sm:$0xff]  }
 0x202   : > { %v1409_v55 = vpop.f32.mrf.mxu1  ;;  %4870 = vmatprep.subr.bf16.mxu1 %v5027_v46 }
 0x203   : > { %4710 = vmatprep.mubr.msk.bf16.mxu0 %vm1086_vm1, %v5519_v49  ;;  %v1520_v61 = vmax.f32 %v1409_v55, 0.0  ;;  %v5029_v55 = vld [vmem:[%s5262_s20 + $0xf8] sm:$0xff]   ;;  %4871 = vmatpush3.bf16.msra.mxu1 %v5027_v46 }
 0x204   : > { %v4645_v57 = vpop.f32.mrf.mxu1  ;;  %4711 = vmatmul.mubr.msk.bf16.gmra.mxu0 %vm1086_vm1, %v5521_v54  ;;  %4793 = vmatmul.mubr.msk.bf16.gmra.mxu1 %vm2225_vm2, %v5029_v55 }
 0x205   : > { %v1523_v59 = vmax.f32 %v4645_v57, 0.0 }
 0x206   : > { %v1412_v60 = vpop.f32.mrf.mxu1 }
 0x207   : > { %v1521_v0 = vmax.f32 %v1412_v60, 0.0  ;;  %v5533_v6 = vpack.c.bf16 %v1523_v59, %v1522_v1  ;;  %v5030_v1 = vld [vmem:[%s6162_s7 + $0x8] sm:$0xff]  }
 0x208   : > { %v4648_v4 = vpop.f32.mrf.mxu1  ;;  %4872 = vmatprep.subr.bf16.mxu1 %v5030_v1 }
 0x209   : > { %v5531_v5 = vpack.c.bf16 %v1521_v0, %v1520_v61  ;;  %v1526_v19 = vmax.f32 %v4648_v4, 0.0  ;;  %4873 = vmatpush3.bf16.msra.mxu1 %v5030_v1 }
 0x20a   : > { %v1425_v7 = vpop.f32.mrf.mxu1 }
 0x20b   : > { %4714 = vmatprep.mubr.msk.bf16.mxu0 %vm1086_vm1, %v5531_v5  ;;  %v1524_v15 = vmax.f32 %v1425_v7, 0.0 }
 0x20c   : > { %v4649_v9 = vpop.f32.mrf.mxu1  ;;  %4715 = vmatmul.mubr.msk.bf16.gmra.mxu0 %vm1086_vm1, %v5533_v6 }
 0x20d   : > { %v1527_v13 = vmax.f32 %v4649_v9, 0.0 }
 0x20e   : > { %v1428_v14 = vpop.f32.mrf.mxu1 }
 0x20f   : > { %v1525_v18 = vmax.f32 %v1428_v14, 0.0  ;;  %v5545_v27 = vpack.c.bf16 %v1527_v13, %v1526_v19 }
 0x210   : > { %v4652_v20 = vpop.f32.mrf.mxu1 }
 0x211   : > { %v5543_v21 = vpack.c.bf16 %v1525_v18, %v1524_v15  ;;  %v1530_v41 = vmax.f32 %v4652_v20, 0.0 }
 0x212   : > { %v1441_v28 = vpop.f32.mrf.mxu1 }
 0x213   : > { %4718 = vmatprep.mubr.msk.bf16.mxu0 %vm1086_vm1, %v5543_v21  ;;  %v1528_v36 = vmax.f32 %v1441_v28, 0.0 }
 0x214   : > { %v4653_v30 = vpop.f32.mrf.mxu1  ;;  %4719 = vmatmul.mubr.msk.bf16.gmra.mxu0 %vm1086_vm1, %v5545_v27 }
 0x215   : > { %v1531_v32 = vmax.f32 %v4653_v30, 0.0 }
 0x216   : > { %v1444_v35 = vpop.f32.mrf.mxu1 }
 0x217   : > { %v1529_v40 = vmax.f32 %v1444_v35, 0.0  ;;  %v5557_v44 = vpack.c.bf16 %v1531_v32, %v1530_v41 }
 0x218   : > { %v4656_v42 = vpop.f32.mrf.mxu1 }
 0x219   : > { %v5555_v43 = vpack.c.bf16 %v1529_v40, %v1528_v36  ;;  %v1534_v60 = vmax.f32 %v4656_v42, 0.0 }
 0x21a   : > { %v1457_v45 = vpop.f32.mrf.mxu1 }
 0x21b   : > { %4722 = vmatprep.mubr.msk.bf16.mxu0 %vm1086_vm1, %v5555_v43  ;;  %v1532_v58 = vmax.f32 %v1457_v45, 0.0 }
 0x21c   : > { %v4657_v48 = vpop.f32.mrf.mxu1  ;;  %4723 = vmatmul.mubr.msk.bf16.gmra.mxu0 %vm1086_vm1, %v5557_v44 }
 0x21d   : > { %v1535_v56 = vmax.f32 %v4657_v48, 0.0 }
 0x21e   : > { %v1460_v57 = vpop.f32.mrf.mxu1 }
 0x21f   : > { %v1533_v59 = vmax.f32 %v1460_v57, 0.0  ;;  %v5572_v0 = vpack.c.bf16 %v1535_v56, %v1534_v60 }
 0x221   : > { %v5570_v61 = vpack.c.bf16 %v1533_v59, %v1532_v58 }
 0x223   : > { %4726 = vmatprep.mubr.msk.bf16.mxu0 %vm1086_vm1, %v5570_v61 }
 0x224   : > { %4727 = vmatmul.mubr.msk.bf16.gmra.mxu0 %vm1086_vm1, %v5572_v0 }
 0x225   : > { %4804 = vmatprep.mubr.msk.bf16.mxu0 %vm1086_vm1, %v5374_v24  ;;  %v5031_v24 = vld [vmem:[%s6162_s7] sm:$0xff]  }
 0x226   : > { %4874 = vmatprep.subr.bf16.mxu1 %v5031_v24 }
 0x227   : > { %4875 = vmatpush3.bf16.msra.mxu1 %v5031_v24 }
 0x22c   : > { %4805 = vmatmul.mubr.msk.bf16.vlgmr.msra.gmra.mxu0 %vm1086_vm1, %v5376_v25 }
 0x22d   : > { %4808 = vmatprep.mubr.msk.bf16.mxu0 %vm1086_vm1, %v5393_v38 }
 0x234   : > { %4809 = vmatmul.mubr.msk.bf16.gmra.mxu0 %vm1086_vm1, %v5395_v22 }
 0x235   : > { %4812 = vmatprep.mubr.msk.bf16.mxu0 %vm1086_vm1, %v5408_v50  ;;  %v5622_v50 = vpop.f32.mrf.mxu1 }
 0x23c   : > { %4813 = vmatmul.mubr.msk.bf16.gmra.mxu0 %vm1086_vm1, %v5410_v51 }
 0x23d   : > { %4816 = vmatprep.mubr.msk.bf16.mxu0 %vm1086_vm1, %v5420_v62 }
 0x244   : > { %4817 = vmatmul.mubr.msk.bf16.gmra.mxu0 %vm1086_vm1, %v5422_v63 }
 0x245   : > { %4820 = vmatprep.mubr.msk.bf16.mxu0 %vm1086_vm1, %v5432_v10 }
 0x24c   : > { %4821 = vmatmul.mubr.msk.bf16.gmra.mxu0 %vm1086_vm1, %v5434_v11  ;;  %v5624_v11 = vpop.f32.mrf.mxu1 }
 0x24d   : > { %4824 = vmatprep.mubr.msk.bf16.mxu0 %vm1086_vm1, %v5444_v23 }
 0x254   : > { %4825 = vmatmul.mubr.msk.bf16.gmra.mxu0 %vm1086_vm1, %v5446_v26 }
 0x255   : > { %4828 = vmatprep.mubr.msk.bf16.mxu0 %vm1086_vm1, %v5456_v37 }
 0x25c   : > { %4829 = vmatmul.mubr.msk.bf16.gmra.mxu0 %vm1086_vm1, %v5458_v39 }
 0x25d   : > { %4832 = vmatprep.mubr.msk.bf16.mxu0 %vm1086_vm1, %v5468_v52  ;;  %v5630_v52 = vpop.f32.mrf.mxu1 }
 0x25f   : > { %v5632_v4 = vpop.f32.mrf.mxu1 }
 0x261   : > { %v5639_v13 = vpop.f32.mrf.mxu1 }
 0x263   : > { %v5643_v28 = vpop.f32.mrf.mxu1 }
 0x264   : > { %4833 = vmatmul.mubr.msk.bf16.gmra.mxu0 %vm1086_vm1, %v5470_v53 }
 0x265   : > { %4836 = vmatprep.mubr.msk.bf16.mxu0 %vm1086_vm1, %v5480_v2  ;;  %v5650_v35 = vpop.f32.mrf.mxu1 }
 0x267   : > { %v5654_v46 = vpop.f32.mrf.mxu1 }
 0x269   : > { %v5662_v58 = vpop.f32.mrf.mxu1 }
 0x26c   : > { %v4668_v25 = vpop.f32.mrf.mxu0  ;;  %4837 = vmatmul.mubr.msk.bf16.gmra.mxu0 %vm1086_vm1, %v5482_v3 }
 0x26d   : > { %v3441_v38 = vmul.f32 1.442695, %v4668_v25  ;;  %4840 = vmatprep.mubr.msk.bf16.mxu0 %vm1086_vm1, %v5492_v16 }
 0x26e   : > { %v1730_v22 = vpop.f32.mrf.mxu0 }
 0x26f   : > { %5032 = vpow2.f32 %v3441_v38  ;;  %v3437_v51 = vmul.f32 1.442695, %v1730_v22  ;;  %v5666_v38 = vpop.f32.mrf.mxu1 }
 0x270   : > { %v4669_v62 = vpop.f32.mrf.mxu0 }
 0x271   : > { %5034 = vpow2.f32 %v3437_v51  ;;  %v3443_v63 = vmul.f32 1.442695, %v4669_v62 }
 0x272   : > { %v1733_v10 = vpop.f32.mrf.mxu0 }
 0x273   : > { %5036 = vpow2.f32 %v3443_v63  ;;  %v3439_v23 = vmul.f32 1.442695, %v1733_v10 }
 0x274   : > { %v4672_v26 = vpop.f32.mrf.mxu0  ;;  %4841 = vmatmul.mubr.msk.bf16.gmra.mxu0 %vm1086_vm1, %v5494_v17 }
 0x275   : > { %5038 = vpow2.f32 %v3439_v23  ;;  %v3449_v37 = vmul.f32 1.442695, %v4672_v26  ;;  %4844 = vmatprep.mubr.msk.bf16.mxu0 %vm1086_vm1, %v5504_v33  ;;  %v5674_v23 = vpop.f32.mrf.mxu1 }
 0x276   : > { %v1746_v39 = vpop.f32.mrf.mxu0 }
 0x277   : > { %5040 = vpow2.f32 %v3449_v37  ;;  %v3445_v2 = vmul.f32 1.442695, %v1746_v39 }
 0x278   : > { %v4673_v53 = vpop.f32.mrf.mxu0 }
 0x279   : > { %v3451_v3 = vmul.f32 1.442695, %v4673_v53 }
 0x27a   : > { %v1749_v16 = vpop.f32.mrf.mxu0 }
 0x27b   : > { %5042 = vpow2.f32 %v3451_v3  ;;  %v3447_v7 = vmul.f32 1.442695, %v1749_v16  ;;  %v5678_v3 = vpop.f32.mrf.mxu1 }
 0x27c   : > { %v5033_v8 = vpop.eup %5032  ;;  %v4676_v9 = vpop.f32.mrf.mxu0  ;;  %4845 = vmatmul.mubr.msk.bf16.gmra.mxu0 %vm1086_vm1, %v5506_v34  ;;  %5044 = vpow2.f32 %v3445_v2 }
 0x27d   : > { %v3457_v17 = vmul.f32 1.442695, %v4676_v9  ;;  %3633 = vrot.lane.b32.xlu1 %v5033_v8, %s5168_s13  ;;  %4848 = vmatprep.mubr.msk.bf16.mxu0 %vm1086_vm1, %v5519_v49  ;;  %5046 = vpow2.f32 %v3447_v7 }
 0x27e   : > { %v5035_v33 = vpop.eup %5034  ;;  %v1762_v12 = vpop.f32.mrf.mxu0 }
 0x27f   : > { %3629 = vrot.lane.b32.xlu0 %v5035_v33, %s5168_s13  ;;  %5048 = vpow2.f32 %v3457_v17  ;;  %v3453_v18 = vmul.f32 1.442695, %v1762_v12  ;;  %v5686_v33 = vpop.f32.mrf.mxu1 }
 0x280   : > { %v5037_v14 = vpop.eup %5036  ;;  %v4677_v15 = vpop.f32.mrf.mxu0 }
 0x281   : > { %v3459_v34 = vmul.f32 1.442695, %v4677_v15  ;;  %3635 = vrot.lane.b32.xlu1 %v5037_v14, %s5168_s13 }
 0x282   : > { %v5039_v19 = vpop.eup %5038  ;;  %v1765_v20 = vpop.f32.mrf.mxu0 }
 0x283   : > { %5050 = vpow2.f32 %v3459_v34  ;;  %v3455_v49 = vmul.f32 1.442695, %v1765_v20  ;;  %3631 = vrot.lane.b32.xlu0 %v5039_v19, %s5168_s13  ;;  %v5690_v19 = vpop.f32.mrf.mxu1 }
 0x284   : > { %v4680_v29 = vpop.f32.mrf.mxu0  ;;  %4849 = vmatmul.mubr.msk.bf16.gmra.mxu0 %vm1086_vm1, %v5521_v54  ;;  %5052 = vpow2.f32 %v3453_v18  ;;  %v5041_v31 = vpop.eup %5040 }
 0x285   : > { %v3465_v30 = vmul.f32 1.442695, %v4680_v29  ;;  %4852 = vmatprep.mubr.msk.bf16.mxu0 %vm1086_vm1, %v5531_v5  ;;  %5054 = vpow2.f32 %v3455_v49 }
 0x286   : > { %v1778_v32 = vpop.f32.mrf.mxu0 }
 0x287   : > { %3641 = vrot.lane.b32.xlu0 %v5041_v31, %s5168_s13  ;;  %5056 = vpow2.f32 %v3465_v30  ;;  %v3461_v41 = vmul.f32 1.442695, %v1778_v32  ;;  %v5696_v32 = vpop.f32.mrf.mxu1 }
 0x288   : > { %v5043_v36 = vpop.eup %5042  ;;  %v4681_v40 = vpop.f32.mrf.mxu0 }
 0x289   : > { %v3467_v42 = vmul.f32 1.442695, %v4681_v40  ;;  %3643 = vrot.lane.b32.xlu1 %v5043_v36, %s5168_s13  ;;  %v5045_v54 = vpop.eup %5044 }
 0x28a   : > { %v1781_v45 = vpop.f32.mrf.mxu0  ;;  %v5047_v47 = vpop.eup %5046 }
 0x28b   : > { %5058 = vpow2.f32 %v3467_v42  ;;  %v3463_v5 = vmul.f32 1.442695, %v1781_v45  ;;  %3637 = vrot.lane.b32.xlu0 %v5045_v54, %s5168_s13  ;;  %v5700_v45 = vpop.f32.mrf.mxu1 }
 0x28c   : > { %v4684_v48 = vpop.f32.mrf.mxu0  ;;  %4853 = vmatmul.mubr.msk.bf16.gmra.mxu0 %vm1086_vm1, %v5533_v6  ;;  %5060 = vpow2.f32 %v3461_v41  ;;  %v5049_v56 = vpop.eup %5048 }
 0x28d   : > { %v3473_v55 = vmul.f32 1.442695, %v4684_v48  ;;  %3639 = vrot.lane.b32.xlu1 %v5047_v47, %s5168_s13  ;;  %4856 = vmatprep.mubr.msk.bf16.mxu0 %vm1086_vm1, %v5543_v21  ;;  %5062 = vpow2.f32 %v3463_v5 }
 0x28e   : > { %v1794_v57 = vpop.f32.mrf.mxu0 }
 0x28f   : > { %3649 = vrot.lane.b32.xlu0 %v5049_v56, %s5168_s13  ;;  %5064 = vpow2.f32 %v3473_v55  ;;  %v3469_v1 = vmul.f32 1.442695, %v1794_v57 }
 0x290   : > { %v5051_v59 = vpop.eup %5050  ;;  %v4685_v60 = vpop.f32.mrf.mxu0 }
 0x291   : > { %v3475_v24 = vmul.f32 1.442695, %v4685_v60  ;;  %3651 = vrot.lane.b32.xlu1 %v5051_v59, %s5168_s13  ;;  %v5053_v6 = vpop.eup %5052  ;;  %v5704_v59 = vpop.f32.mrf.mxu1 }
 0x292   : > { %v1797_v25 = vpop.f32.mrf.mxu0  ;;  %v5055_v22 = vpop.eup %5054 }
 0x293   : > { %5066 = vpow2.f32 %v3475_v24  ;;  %v3471_v21 = vmul.f32 1.442695, %v1797_v25  ;;  %3645 = vrot.lane.b32.xlu0 %v5053_v6, %s5168_s13 }
 0x294   : > { %v4688_v51 = vpop.f32.mrf.mxu0  ;;  %4857 = vmatmul.mubr.msk.bf16.gmra.mxu0 %vm1086_vm1, %v5545_v27  ;;  %5068 = vpow2.f32 %v3469_v1  ;;  %v5057_v63 = vpop.eup %5056 }
 0x295   : > { %v3481_v62 = vmul.f32 1.442695, %v4688_v51  ;;  %3647 = vrot.lane.b32.xlu1 %v5055_v22, %s5168_s13  ;;  %4860 = vmatprep.mubr.msk.bf16.mxu0 %vm1086_vm1, %v5555_v43  ;;  %5070 = vpow2.f32 %v3471_v21  ;;  %v5708_v22 = vpop.f32.mrf.mxu1 }
 0x296   : > { %v1810_v10 = vpop.f32.mrf.mxu0 }
 0x297   : > { %3657 = vrot.lane.b32.xlu0 %v5057_v63, %s5168_s13  ;;  %5072 = vpow2.f32 %v3481_v62  ;;  %v3477_v39 = vmul.f32 1.442695, %v1810_v10 }
 0x298   : > { %v5059_v26 = vpop.eup %5058  ;;  %v4689_v37 = vpop.f32.mrf.mxu0 }
 0x299   : > { %v3483_v53 = vmul.f32 1.442695, %v4689_v37  ;;  %3659 = vrot.lane.b32.xlu1 %v5059_v26, %s5168_s13  ;;  %v5061_v27 = vpop.eup %5060 }
 0x29a   : > { %v1813_v2 = vpop.f32.mrf.mxu0  ;;  %v5063_v16 = vpop.eup %5062 }
 0x29b   : > { %5074 = vpow2.f32 %v3483_v53  ;;  %v3479_v43 = vmul.f32 1.442695, %v1813_v2  ;;  %3653 = vrot.lane.b32.xlu0 %v5061_v27, %s5168_s13 }
 0x29c   : > { %v4692_v7 = vpop.f32.mrf.mxu0  ;;  %4861 = vmatmul.mubr.msk.bf16.gmra.mxu0 %vm1086_vm1, %v5557_v44  ;;  %5076 = vpow2.f32 %v3477_v39  ;;  %v5065_v9 = vpop.eup %5064 }
 0x29d   : > { %v3489_v8 = vmul.f32 1.442695, %v4692_v7  ;;  %3655 = vrot.lane.b32.xlu1 %v5063_v16, %s5168_s13  ;;  %4864 = vmatprep.mubr.msk.bf16.mxu0 %vm1086_vm1, %v5570_v61  ;;  %5078 = vpow2.f32 %v3479_v43  ;;  %v5712_v39 = vpop.f32.mrf.mxu1 }
 0x29e   : > { %v1826_v17 = vpop.f32.mrf.mxu0 }
 0x29f   : > { %3665 = vrot.lane.b32.xlu0 %v5065_v9, %s5168_s13  ;;  %5080 = vpow2.f32 %v3489_v8  ;;  %v3485_v15 = vmul.f32 1.442695, %v1826_v17  ;;  %v5716_v8 = vpop.f32.mrf.mxu1 }
 0x2a0   : > { %v5067_v12 = vpop.eup %5066  ;;  %v4693_v14 = vpop.f32.mrf.mxu0 }
 0x2a1   : > { %v3491_v18 = vmul.f32 1.442695, %v4693_v14  ;;  %3667 = vrot.lane.b32.xlu1 %v5067_v12, %s5168_s13  ;;  %v5069_v44 = vpop.eup %5068 }
 0x2a2   : > { %v1829_v34 = vpop.f32.mrf.mxu0  ;;  %v5071_v20 = vpop.eup %5070 }
 0x2a3   : > { %5082 = vpow2.f32 %v3491_v18  ;;  %v3487_v61 = vmul.f32 1.442695, %v1829_v34  ;;  %3661 = vrot.lane.b32.xlu0 %v5069_v44, %s5168_s13  ;;  %v5720_v44 = vpop.f32.mrf.mxu1 }
 0x2a4   : > { %v4696_v49 = vpop.f32.mrf.mxu0  ;;  %4865 = vmatmul.mubr.msk.bf16.gmra.mxu0 %vm1086_vm1, %v5572_v0  ;;  %5084 = vpow2.f32 %v3485_v15  ;;  %v5073_v30 = vpop.eup %5072 }
 0x2a5   : > { %v3497_v29 = vmul.f32 1.442695, %v4696_v49  ;;  %3663 = vrot.lane.b32.xlu1 %v5071_v20, %s5168_s13  ;;  %5086 = vpow2.f32 %v3487_v61 }
 0x2a6   : > { %v1842_v31 = vpop.f32.mrf.mxu0 }
 0x2a7   : > { %3673 = vrot.lane.b32.xlu0 %v5073_v30, %s5168_s13  ;;  %5088 = vpow2.f32 %v3497_v29  ;;  %v3493_v41 = vmul.f32 1.442695, %v1842_v31  ;;  %v5724_v31 = vpop.f32.mrf.mxu1 }
 0x2a8   : > { %v5075_v36 = vpop.eup %5074  ;;  %v4697_v40 = vpop.f32.mrf.mxu0 }
 0x2a9   : > { %v3499_v42 = vmul.f32 1.442695, %v4697_v40  ;;  %3675 = vrot.lane.b32.xlu1 %v5075_v36, %s5168_s13  ;;  %v5077_v54 = vpop.eup %5076 }
 0x2aa   : > { %v1845_v0 = vpop.f32.mrf.mxu0  ;;  %v5079_v47 = vpop.eup %5078 }
 0x2ab   : > { %5090 = vpow2.f32 %v3499_v42  ;;  %v3495_v5 = vmul.f32 1.442695, %v1845_v0  ;;  %3669 = vrot.lane.b32.xlu0 %v5077_v54, %s5168_s13 }
 0x2ac   : > { %v4700_v48 = vpop.f32.mrf.mxu0  ;;  %5092 = vpow2.f32 %v3493_v41  ;;  %v5081_v56 = vpop.eup %5080 }
 0x2ad   : > { %v3505_v55 = vmul.f32 1.442695, %v4700_v48  ;;  %3671 = vrot.lane.b32.xlu1 %v5079_v47, %s5168_s13  ;;  %5094 = vpow2.f32 %v3495_v5  ;;  %v5728_v5 = vpop.f32.mrf.mxu1 }
 0x2ae   : > { %v1858_v57 = vpop.f32.mrf.mxu0 }
 0x2af   : > { %3681 = vrot.lane.b32.xlu0 %v5081_v56, %s5168_s13  ;;  %5096 = vpow2.f32 %v3505_v55  ;;  %v3501_v24 = vmul.f32 1.442695, %v1858_v57 }
 0x2b0   : > { %v5083_v60 = vpop.eup %5082  ;;  %v4701_v1 = vpop.f32.mrf.mxu0 }
 0x2b1   : > { %v3507_v6 = vmul.f32 1.442695, %v4701_v1  ;;  %3683 = vrot.lane.b32.xlu1 %v5083_v60, %s5168_s13  ;;  %v5085_v25 = vpop.eup %5084  ;;  %v5732_v1 = vpop.f32.mrf.mxu1 }
 0x2b2   : > { %v1861_v21 = vpop.f32.mrf.mxu0  ;;  %v5087_v62 = vpop.eup %5086 }
 0x2b3   : > { %5098 = vpow2.f32 %v3507_v6  ;;  %v3503_v51 = vmul.f32 1.442695, %v1861_v21  ;;  %3677 = vrot.lane.b32.xlu0 %v5085_v25, %s5168_s13 }
 0x2b4   : > { %v4704_v63 = vpop.f32.mrf.mxu0  ;;  %5100 = vpow2.f32 %v3501_v24  ;;  %v5089_v26 = vpop.eup %5088 }
 0x2b5   : > { %v3513_v10 = vmul.f32 1.442695, %v4704_v63  ;;  %3679 = vrot.lane.b32.xlu1 %v5087_v62, %s5168_s13  ;;  %5102 = vpow2.f32 %v3503_v51  ;;  %v5736_v63 = vpop.f32.mrf.mxu1 }
 0x2b6   : > { %v1874_v37 = vpop.f32.mrf.mxu0 }
 0x2b7   : > { %3689 = vrot.lane.b32.xlu0 %v5089_v26, %s5168_s13  ;;  %5104 = vpow2.f32 %v3513_v10  ;;  %v3509_v2 = vmul.f32 1.442695, %v1874_v37 }
 0x2b8   : > { %v5091_v53 = vpop.eup %5090  ;;  %v4705_v27 = vpop.f32.mrf.mxu0 }
 0x2b9   : > { %v3515_v43 = vmul.f32 1.442695, %v4705_v27  ;;  %3691 = vrot.lane.b32.xlu1 %v5091_v53, %s5168_s13  ;;  %v5093_v16 = vpop.eup %5092 }
 0x2ba   : > { %v1877_v7 = vpop.f32.mrf.mxu0  ;;  %v5095_v17 = vpop.eup %5094 }
 0x2bb   : > { %5106 = vpow2.f32 %v3515_v43  ;;  %v3511_v9 = vmul.f32 1.442695, %v1877_v7  ;;  %3685 = vrot.lane.b32.xlu0 %v5093_v16, %s5168_s13  ;;  %v5740_v43 = vpop.f32.mrf.mxu1 }
 0x2bc   : > { %v4708_v12 = vpop.f32.mrf.mxu0  ;;  %5108 = vpow2.f32 %v3509_v2  ;;  %v5097_v15 = vpop.eup %5096 }
 0x2bd   : > { %v3521_v14 = vmul.f32 1.442695, %v4708_v12  ;;  %3687 = vrot.lane.b32.xlu1 %v5095_v17, %s5168_s13  ;;  %5110 = vpow2.f32 %v3511_v9 }
 0x2be   : > { %v1890_v18 = vpop.f32.mrf.mxu0 }
 0x2bf   : > { %3697 = vrot.lane.b32.xlu0 %v5097_v15, %s5168_s13  ;;  %5112 = vpow2.f32 %v3521_v14  ;;  %v3517_v20 = vmul.f32 1.442695, %v1890_v18  ;;  %v5744_v15 = vpop.f32.mrf.mxu1 }
 0x2c0   : > { %v5099_v34 = vpop.eup %5098  ;;  %v4709_v61 = vpop.f32.mrf.mxu0 }
 0x2c1   : > { %v3523_v49 = vmul.f32 1.442695, %v4709_v61  ;;  %3699 = vrot.lane.b32.xlu1 %v5099_v34, %s5168_s13  ;;  %v5101_v29 = vpop.eup %5100 }
 0x2c2   : > { %v1893_v30 = vpop.f32.mrf.mxu0  ;;  %v5103_v40 = vpop.eup %5102 }
 0x2c3   : > { %5114 = vpow2.f32 %v3523_v49  ;;  %v3519_v36 = vmul.f32 1.442695, %v1893_v30  ;;  %3693 = vrot.lane.b32.xlu0 %v5101_v29, %s5168_s13  ;;  %v5748_v30 = vpop.f32.mrf.mxu1 }
 0x2c4   : > { %v4712_v41 = vpop.f32.mrf.mxu0  ;;  %5116 = vpow2.f32 %v3517_v20  ;;  %v5105_v54 = vpop.eup %5104 }
 0x2c5   : > { %v3529_v42 = vmul.f32 1.442695, %v4712_v41  ;;  %3695 = vrot.lane.b32.xlu1 %v5103_v40, %s5168_s13  ;;  %5118 = vpow2.f32 %v3519_v36 }
 0x2c6   : > { %v1906_v0 = vpop.f32.mrf.mxu0 }
 0x2c7   : > { %3705 = vrot.lane.b32.xlu0 %v5105_v54, %s5168_s13  ;;  %5120 = vpow2.f32 %v3529_v42  ;;  %v3525_v55 = vmul.f32 1.442695, %v1906_v0 }
 0x2c8   : > { %v5107_v47 = vpop.eup %5106  ;;  %v4713_v48 = vpop.f32.mrf.mxu0 }
 0x2c9   : > { %v3531_v56 = vmul.f32 1.442695, %v4713_v48  ;;  %3707 = vrot.lane.b32.xlu1 %v5107_v47, %s5168_s13  ;;  %v5109_v57 = vpop.eup %5108  ;;  %v5752_v47 = vpop.f32.mrf.mxu1 }
 0x2ca   : > { %v1909_v60 = vpop.f32.mrf.mxu0  ;;  %v5111_v6 = vpop.eup %5110 }
 0x2cb   : > { %5122 = vpow2.f32 %v3531_v56  ;;  %v3527_v24 = vmul.f32 1.442695, %v1909_v60  ;;  %3701 = vrot.lane.b32.xlu0 %v5109_v57, %s5168_s13 }
 0x2cc   : > { %v4716_v25 = vpop.f32.mrf.mxu0  ;;  %5124 = vpow2.f32 %v3525_v55  ;;  %v5113_v51 = vpop.eup %5112 }
 0x2cd   : > { %v3537_v21 = vmul.f32 1.442695, %v4716_v25  ;;  %3703 = vrot.lane.b32.xlu1 %v5111_v6, %s5168_s13  ;;  %5126 = vpow2.f32 %v3527_v24  ;;  %v5756_v6 = vpop.f32.mrf.mxu1 }
 0x2ce   : > { %v1922_v62 = vpop.f32.mrf.mxu0 }
 0x2cf   : > { %3713 = vrot.lane.b32.xlu0 %v5113_v51, %s5168_s13  ;;  %5128 = vpow2.f32 %v3537_v21  ;;  %v3533_v37 = vmul.f32 1.442695, %v1922_v62 }
 0x2d0   : > { %v5115_v10 = vpop.eup %5114  ;;  %v4717_v26 = vpop.f32.mrf.mxu0 }
 0x2d1   : > { %v3539_v53 = vmul.f32 1.442695, %v4717_v26  ;;  %3715 = vrot.lane.b32.xlu1 %v5115_v10, %s5168_s13  ;;  %v5117_v27 = vpop.eup %5116  ;;  %v5760_v26 = vpop.f32.mrf.mxu1 }
 0x2d2   : > { %v1925_v2 = vpop.f32.mrf.mxu0  ;;  %v5119_v7 = vpop.eup %5118 }
 0x2d3   : > { %5130 = vpow2.f32 %v3539_v53  ;;  %v3535_v16 = vmul.f32 1.442695, %v1925_v2  ;;  %3709 = vrot.lane.b32.xlu0 %v5117_v27, %s5168_s13 }
 0x2d4   : > { %v4720_v9 = vpop.f32.mrf.mxu0  ;;  %5132 = vpow2.f32 %v3533_v37  ;;  %v5121_v12 = vpop.eup %5120 }
 0x2d5   : > { %v3545_v17 = vmul.f32 1.442695, %v4720_v9  ;;  %3711 = vrot.lane.b32.xlu1 %v5119_v7, %s5168_s13  ;;  %5134 = vpow2.f32 %v3535_v16  ;;  %v5764_v9 = vpop.f32.mrf.mxu1 }
 0x2d6   : > { %v1938_v14 = vpop.f32.mrf.mxu0 }
 0x2d7   : > { %3721 = vrot.lane.b32.xlu0 %v5121_v12, %s5168_s13  ;;  %5136 = vpow2.f32 %v3545_v17  ;;  %v3541_v61 = vmul.f32 1.442695, %v1938_v14 }
 0x2d8   : > { %v5123_v18 = vpop.eup %5122  ;;  %v4721_v34 = vpop.f32.mrf.mxu0 }
 0x2d9   : > { %v3547_v20 = vmul.f32 1.442695, %v4721_v34  ;;  %3723 = vrot.lane.b32.xlu1 %v5123_v18, %s5168_s13  ;;  %v5125_v49 = vpop.eup %5124 }
 0x2da   : > { %v1941_v29 = vpop.f32.mrf.mxu0  ;;  %v5127_v40 = vpop.eup %5126 }
 0x2db   : > { %5138 = vpow2.f32 %v3547_v20  ;;  %v3543_v36 = vmul.f32 1.442695, %v1941_v29  ;;  %3717 = vrot.lane.b32.xlu0 %v5125_v49, %s5168_s13  ;;  %v5768_v20 = vpop.f32.mrf.mxu1 }
 0x2dc   : > { %v4724_v41 = vpop.f32.mrf.mxu0  ;;  %5140 = vpow2.f32 %v3541_v61  ;;  %v5129_v54 = vpop.eup %5128 }
 0x2dd   : > { %v3553_v42 = vmul.f32 1.442695, %v4724_v41  ;;  %3719 = vrot.lane.b32.xlu1 %v5127_v40, %s5168_s13  ;;  %5142 = vpow2.f32 %v3543_v36 }
 0x2de   : > { %v1954_v0 = vpop.f32.mrf.mxu0 }
 0x2df   : > { %3729 = vrot.lane.b32.xlu0 %v5129_v54, %s5168_s13  ;;  %5144 = vpow2.f32 %v3553_v42  ;;  %v3549_v56 = vmul.f32 1.442695, %v1954_v0  ;;  %v5775_v0 = vpop.f32.mrf.mxu1 }
 0x2e0   : > { %v5131_v48 = vpop.eup %5130  ;;  %v4725_v55 = vpop.f32.mrf.mxu0 }
 0x2e1   : > { %v3555_v57 = vmul.f32 1.442695, %v4725_v55  ;;  %3731 = vrot.lane.b32.xlu1 %v5131_v48, %s5168_s13  ;;  %v5133_v60 = vpop.eup %5132 }
 0x2e2   : > { %v1957_v24 = vpop.f32.mrf.mxu0  ;;  %v5135_v21 = vpop.eup %5134 }
 0x2e3   : > { %5146 = vpow2.f32 %v3555_v57  ;;  %v3551_v25 = vmul.f32 1.442695, %v1957_v24  ;;  %3725 = vrot.lane.b32.xlu0 %v5133_v60, %s5168_s13 }
 0x2e4   : > { %v4728_v51 = vpop.f32.mrf.mxu0  ;;  %5148 = vpow2.f32 %v3549_v56  ;;  %v5137_v62 = vpop.eup %5136 }
 0x2e5   : > { %3727 = vrot.lane.b32.xlu1 %v5135_v21, %s5168_s13  ;;  %5150 = vpow2.f32 %v3551_v25  ;;  %v3561_v27 = vmul.f32 1.442695, %v4728_v51  ;;  %v5780_v21 = vpop.f32.mrf.mxu1 }
 0x2e6   : > { %v1970_v10 = vpop.f32.mrf.mxu0 }
 0x2e7   : > { %v3557_v37 = vmul.f32 1.442695, %v1970_v10  ;;  %3737 = vrot.lane.b32.xlu0 %v5137_v62, %s5168_s13 }
 0x2e8   : > { %v5139_v53 = vpop.eup %5138  ;;  %v4729_v2 = vpop.f32.mrf.mxu0 }
 0x2e9   : > { %5152 = vpow2.f32 %v3557_v37  ;;  %3739 = vrot.lane.b32.xlu1 %v5139_v53, %s5168_s13  ;;  %v5141_v16 = vpop.eup %5140  ;;  %v3563_v18 = vmul.f32 1.442695, %v4729_v2 }
 0x2ea   : > { %v1973_v7 = vpop.f32.mrf.mxu0  ;;  %v5143_v12 = vpop.eup %5142  ;;  %5154 = vpow2.f32 %v3561_v27 }
 0x2eb   : > { %v3559_v17 = vmul.f32 1.442695, %v1973_v7  ;;  %3733 = vrot.lane.b32.xlu0 %v5141_v16, %s5168_s13  ;;  %v5788_v16 = vpop.f32.mrf.mxu1 }
 0x2ec   : > { %v4806_v14 = vpop.f32.mrf.mxu0  ;;  %v5145_v34 = vpop.eup %5144 }
 0x2ed   : > { %5156 = vpow2.f32 %v3559_v17  ;;  %3735 = vrot.lane.b32.xlu1 %v5143_v12, %s5168_s13  ;;  %v2678_v42 = vadd.f32 %v4806_v14, %v5622_v50 }
 0x2ee   : > { %v2669_v61 = vpop.f32.mrf.mxu0  ;;  %5158 = vpow2.f32 %v3563_v18 }
 0x2ef   : > { %3745 = vrot.lane.b32.xlu0 %v5145_v34, %s5168_s13  ;;  %v2670_v36 = vadd.f32 %v2669_v61, %v5624_v11  ;;  %v5793_v61 = vpop.f32.mrf.mxu1 }
 0x2f0   : > { %v5147_v49 = vpop.eup %5146  ;;  %v4807_v29 = vpop.f32.mrf.mxu0 }
 0x2f1   : > { %v2681_v40 = vadd.f32 %v4807_v29, %v5630_v52  ;;  %3747 = vrot.lane.b32.xlu1 %v5147_v49, %s5168_s13  ;;  %v5149_v41 = vpop.eup %5148  ;;  %v2924_v60 = vmax.f32 %v2670_v36, 0.0  ;;  %v2926_v52 = vmax.f32 %v2678_v42, 0.0  ;;  %v5801_v42 = vpop.f32.mrf.mxu1 }
 0x2f2   : > { %v2672_v54 = vpop.f32.mrf.mxu0  ;;  %v5151_v55 = vpop.eup %5150 }
 0x2f3   : > { %v2673_v48 = vadd.f32 %v2672_v54, %v5632_v4  ;;  %3741 = vrot.lane.b32.xlu0 %v5149_v41, %s5168_s13  ;;  %v2927_v56 = vmax.f32 %v2681_v40, 0.0 }
 0x2f4   : > { %v4810_v57 = vpop.f32.mrf.mxu0 }
 0x2f5   : > { %v2925_v24 = vmax.f32 %v2673_v48, 0.0  ;;  %3743 = vrot.lane.b32.xlu1 %v5151_v55, %s5168_s13  ;;  %v2989_v51 = vpack.c.bf16 %v2927_v56, %v2926_v52  ;;  %v2694_v27 = vadd.f32 %v4810_v57, %v5639_v13 }
 0x2f6   : > { %v5153_v11 = vpop.eup %5152  ;;  %v2685_v25 = vpop.f32.mrf.mxu0 }
 0x2f7   : > { %v2988_v50 = vpack.c.bf16 %v2925_v24, %v2924_v60  ;;  %3749 = vrot.lane.b32.xlu0 %v5153_v11, %s5168_s13  ;;  %v5155_v4 = vpop.eup %5154  ;;  %v2686_v10 = vadd.f32 %v2685_v25, %v5643_v28  ;;  %v2930_v18 = vmax.f32 %v2694_v27, 0.0 }
 0x2f8   : > { %v4811_v62 = vpop.f32.mrf.mxu0 }
 0x2f9   : > { %v2697_v37 = vadd.f32 %v4811_v62, %v5650_v35  ;;  %4876 = vmatprep.mubr.msk.bf16.mxu1 %vm1086_vm1, %v2988_v50  ;;  %v2928_v12 = vmax.f32 %v2686_v10, 0.0 }
 0x2fa   : > { %v5157_v53 = vpop.eup %5156  ;;  %v2688_v2 = vpop.f32.mrf.mxu0  ;;  %4877 = vmatmul.mubr.msk.bf16.vlgmr.msra.gmra.mxu1 %vm1086_vm1, %v2989_v51 }
 0x2fb   : > { %v2689_v7 = vadd.f32 %v2688_v2, %v5654_v46  ;;  %3753 = vrot.lane.b32.xlu0 %v5155_v4, %s5168_s13  ;;  %3751 = vrot.lane.b32.xlu1 %v5157_v53, %s5168_s13  ;;  %v2931_v17 = vmax.f32 %v2697_v37, 0.0  ;;  %v5159_v14 = vpop.eup %5158 }
 0x2fc   : > { %v4814_v28 = vpop.f32.mrf.mxu0 }
 0x2fd   : > { %v2929_v35 = vmax.f32 %v2689_v7, 0.0  ;;  %v2991_v49 = vpack.c.bf16 %v2931_v17, %v2930_v18  ;;  %v2710_v40 = vadd.f32 %v4814_v28, %v5662_v58 }
 0x2fe   : > { %v2701_v34 = vpop.f32.mrf.mxu0 }
 0x2ff   : > { %v2990_v13 = vpack.c.bf16 %v2929_v35, %v2928_v12  ;;  %3755 = vrot.lane.b32.xlu1 %v5159_v14, %s5168_s13  ;;  %v2702_v46 = vadd.f32 %v2701_v34, %v5666_v38  ;;  %v2934_v60 = vmax.f32 %v2710_v40, 0.0  ;;  %v5804_v38 = vpop.f32.mrf.mxu1 }
 0x300   : > { %v4815_v29 = vpop.f32.mrf.mxu0 }
 0x301   : > { %v2713_v36 = vadd.f32 %v4815_v29, %v5674_v23  ;;  %4880 = vmatprep.mubr.msk.bf16.mxu1 %vm1086_vm1, %v2990_v13  ;;  %v2932_v56 = vmax.f32 %v2702_v46, 0.0  ;;  %v5811_v51 = vpop.f32.mrf.mxu1 }
 0x302   : > { %v2704_v41 = vpop.f32.mrf.mxu0  ;;  %4881 = vmatmul.mubr.msk.bf16.gmra.mxu1 %vm1086_vm1, %v2991_v49 }
 0x303   : > { %v2705_v54 = vadd.f32 %v2704_v41, %v5678_v3  ;;  %v2935_v48 = vmax.f32 %v2713_v36, 0.0 }
 0x304   : > { %v4818_v55 = vpop.f32.mrf.mxu0 }
 0x305   : > { %v2933_v57 = vmax.f32 %v2705_v54, 0.0  ;;  %v2993_v11 = vpack.c.bf16 %v2935_v48, %v2934_v60  ;;  %v2726_v50 = vadd.f32 %v4818_v55, %v5686_v33 }
 0x306   : > { %v2717_v24 = vpop.f32.mrf.mxu0 }
 0x307   : > { %v2992_v23 = vpack.c.bf16 %v2933_v57, %v2932_v56  ;;  %v2718_v58 = vadd.f32 %v2717_v24, %v5690_v19  ;;  %v2938_v27 = vmax.f32 %v2726_v50, 0.0  ;;  %v5814_v19 = vpop.f32.mrf.mxu1 }
 0x308   : > { %v4819_v52 = vpop.f32.mrf.mxu0 }
 0x309   : > { %v2729_v25 = vadd.f32 %v4819_v52, %v5696_v32  ;;  %4884 = vmatprep.mubr.msk.bf16.mxu1 %vm1086_vm1, %v2992_v23  ;;  %v2936_v37 = vmax.f32 %v2718_v58, 0.0  ;;  %v5821_v35 = vpop.f32.mrf.mxu1 }
 0x30a   : > { %v2720_v3 = vpop.f32.mrf.mxu0  ;;  %4885 = vmatmul.mubr.msk.bf16.gmra.mxu1 %vm1086_vm1, %v2993_v11 }
 0x30b   : > { %v2721_v62 = vadd.f32 %v2720_v3, %v5700_v45  ;;  %v2939_v4 = vmax.f32 %v2729_v25, 0.0 }
 0x30c   : > { %v4822_v10 = vpop.f32.mrf.mxu0 }
 0x30d   : > { %v2937_v53 = vmax.f32 %v2721_v62, 0.0  ;;  %v2995_v7 = vpack.c.bf16 %v2939_v4, %v2938_v27  ;;  %v2742_v12 = vadd.f32 %v4822_v10, %v5704_v59 }
 0x30e   : > { %v2733_v2 = vpop.f32.mrf.mxu0 }
 0x30f   : > { %v2994_v32 = vpack.c.bf16 %v2937_v53, %v2936_v37  ;;  %v2734_v33 = vadd.f32 %v2733_v2, %v5708_v22  ;;  %v2942_v29 = vmax.f32 %v2742_v12, 0.0  ;;  %v5824_v22 = vpop.f32.mrf.mxu1 }
 0x310   : > { %v4823_v17 = vpop.f32.mrf.mxu0 }
 0x311   : > { %v2745_v28 = vadd.f32 %v4823_v17, %v5712_v39  ;;  %4888 = vmatprep.mubr.msk.bf16.mxu1 %vm1086_vm1, %v2994_v32  ;;  %v2940_v13 = vmax.f32 %v2734_v33, 0.0  ;;  %v5831_v48 = vpop.f32.mrf.mxu1 }
 0x312   : > { %v2736_v45 = vpop.f32.mrf.mxu0  ;;  %4889 = vmatmul.mubr.msk.bf16.gmra.mxu1 %vm1086_vm1, %v2995_v7 }
 0x313   : > { %v2737_v14 = vadd.f32 %v2736_v45, %v5716_v8  ;;  %v2943_v18 = vmax.f32 %v2745_v28, 0.0 }
 0x314   : > { %v4826_v34 = vpop.f32.mrf.mxu0 }
 0x315   : > { %v2941_v49 = vmax.f32 %v2737_v14, 0.0  ;;  %v2997_v36 = vpack.c.bf16 %v2943_v18, %v2942_v29  ;;  %v2758_v54 = vadd.f32 %v4826_v34, %v5720_v44 }
 0x316   : > { %v2749_v46 = vpop.f32.mrf.mxu0 }
 0x317   : > { %v2996_v39 = vpack.c.bf16 %v2941_v49, %v2940_v13  ;;  %v2750_v59 = vadd.f32 %v2749_v46, %v5724_v31  ;;  %v2946_v23 = vmax.f32 %v2758_v54, 0.0  ;;  %v5834_v31 = vpop.f32.mrf.mxu1 }
 0x318   : > { %v4827_v40 = vpop.f32.mrf.mxu0 }
 0x319   : > { %v2761_v41 = vadd.f32 %v4827_v40, %v5728_v5  ;;  %4892 = vmatprep.mubr.msk.bf16.mxu1 %vm1086_vm1, %v2996_v39  ;;  %v2944_v60 = vmax.f32 %v2750_v59, 0.0  ;;  %v5841_v3 = vpop.f32.mrf.mxu1 }
 0x31a   : > { %v2752_v8 = vpop.f32.mrf.mxu0  ;;  %4893 = vmatmul.mubr.msk.bf16.gmra.mxu1 %vm1086_vm1, %v2997_v36 }
 0x31b   : > { %v2753_v55 = vadd.f32 %v2752_v8, %v5732_v1  ;;  %v2947_v56 = vmax.f32 %v2761_v41, 0.0 }
 0x31c   : > { %v4830_v57 = vpop.f32.mrf.mxu0 }
 0x31d   : > { %v2945_v24 = vmax.f32 %v2753_v55, 0.0  ;;  %v2999_v52 = vpack.c.bf16 %v2947_v56, %v2946_v23  ;;  %v2774_v50 = vadd.f32 %v4830_v57, %v5736_v63 }
 0x31e   : > { %v2765_v11 = vpop.f32.mrf.mxu0 }
 0x31f   : > { %v2998_v5 = vpack.c.bf16 %v2945_v24, %v2944_v60  ;;  %v2766_v44 = vadd.f32 %v2765_v11, %v5740_v43  ;;  %v2950_v27 = vmax.f32 %v2774_v50, 0.0  ;;  %v5844_v43 = vpop.f32.mrf.mxu1 }
 0x320   : > { %v4831_v58 = vpop.f32.mrf.mxu0 }
 0x321   : > { %v2777_v25 = vadd.f32 %v4831_v58, %v5744_v15  ;;  %4896 = vmatprep.mubr.msk.bf16.mxu1 %vm1086_vm1, %v2998_v5  ;;  %v2948_v37 = vmax.f32 %v2766_v44, 0.0  ;;  %v5851_v28 = vpop.f32.mrf.mxu1 }
 0x322   : > { %v2768_v1 = vpop.f32.mrf.mxu0  ;;  %4897 = vmatmul.mubr.msk.bf16.gmra.mxu1 %vm1086_vm1, %v2999_v52 }
 0x323   : > { %v2769_v62 = vadd.f32 %v2768_v1, %v5748_v30  ;;  %v2951_v4 = vmax.f32 %v2777_v25, 0.0 }
 0x324   : > { %v4834_v10 = vpop.f32.mrf.mxu0 }
 0x325   : > { %v2949_v53 = vmax.f32 %v2769_v62, 0.0  ;;  %v3001_v32 = vpack.c.bf16 %v2951_v4, %v2950_v27  ;;  %v2790_v33 = vadd.f32 %v4834_v10, %v5752_v47 }
 0x326   : > { %v2781_v2 = vpop.f32.mrf.mxu0 }
 0x327   : > { %v3000_v15 = vpack.c.bf16 %v2949_v53, %v2948_v37  ;;  %v2782_v63 = vadd.f32 %v2781_v2, %v5756_v6  ;;  %v2954_v13 = vmax.f32 %v2790_v33, 0.0  ;;  %v5854_v6 = vpop.f32.mrf.mxu1 }
 0x328   : > { %v4835_v7 = vpop.f32.mrf.mxu0 }
 0x329   : > { %v2793_v17 = vadd.f32 %v4835_v7, %v5760_v26  ;;  %4900 = vmatprep.mubr.msk.bf16.mxu1 %vm1086_vm1, %v3000_v15  ;;  %v2952_v18 = vmax.f32 %v2782_v63, 0.0  ;;  %v5861_v40 = vpop.f32.mrf.mxu1 }
 0x32a   : > { %v2784_v30 = vpop.f32.mrf.mxu0  ;;  %4901 = vmatmul.mubr.msk.bf16.gmra.mxu1 %vm1086_vm1, %v3001_v32 }
 0x32b   : > { %v2785_v12 = vadd.f32 %v2784_v30, %v5764_v9  ;;  %v2955_v45 = vmax.f32 %v2793_v17, 0.0 }
 0x32c   : > { %v4838_v14 = vpop.f32.mrf.mxu0 }
 0x32d   : > { %v2953_v34 = vmax.f32 %v2785_v12, 0.0  ;;  %v3003_v29 = vpack.c.bf16 %v2955_v45, %v2954_v13  ;;  %v2806_v36 = vadd.f32 %v4838_v14, %v5768_v20 }
 0x32e   : > { %v2797_v49 = vpop.f32.mrf.mxu0 }
 0x32f   : > { %v3002_v26 = vpack.c.bf16 %v2953_v34, %v2952_v18  ;;  %v2798_v47 = vadd.f32 %v2797_v49, %v5775_v0  ;;  %v2958_v56 = vmax.f32 %v2806_v36, 0.0  ;;  %v4783_v0 = vpop.f32.mrf.mxu1 }
 0x330   : > { %v4839_v46 = vpop.f32.mrf.mxu0 }
 0x331   : > { %v2809_v39 = vadd.f32 %v4839_v46, %v5780_v21  ;;  %4904 = vmatprep.mubr.msk.bf16.mxu1 %vm1086_vm1, %v3002_v26  ;;  %v2956_v8 = vmax.f32 %v2798_v47, 0.0 }
 0x332   : > { %v2800_v9 = vpop.f32.mrf.mxu0  ;;  %4905 = vmatmul.mubr.msk.bf16.gmra.mxu1 %vm1086_vm1, %v3003_v29 }
 0x333   : > { %v2801_v59 = vadd.f32 %v2800_v9, %v5788_v16  ;;  %v2959_v41 = vmax.f32 %v2809_v39, 0.0  ;;  %v2551_v16 = vpop.f32.mrf.mxu1 }
 0x334   : > { %v4842_v54 = vpop.f32.mrf.mxu0 }
 0x335   : > { %v2957_v55 = vmax.f32 %v2801_v59, 0.0  ;;  %v3005_v21 = vpack.c.bf16 %v2959_v41, %v2958_v56  ;;  %v2822_v11 = vadd.f32 %v4842_v54, %v5793_v61  ;;  %v4786_v4 = vpop.f32.mrf.mxu1 }
 0x336   : > { %v2813_v57 = vpop.f32.mrf.mxu0 }
 0x337   : > { %v3004_v60 = vpack.c.bf16 %v2957_v55, %v2956_v8  ;;  %v2814_v23 = vadd.f32 %v2813_v57, %v5801_v42  ;;  %v2962_v1 = vmax.f32 %v2822_v11, 0.0 }
 0x338   : > { %v4843_v24 = vpop.f32.mrf.mxu0 }
 0x339   : > { %v2825_v20 = vadd.f32 %v4843_v24, %v5804_v38  ;;  %4908 = vmatprep.mubr.msk.bf16.mxu1 %vm1086_vm1, %v3004_v60  ;;  %v2960_v25 = vmax.f32 %v2814_v23, 0.0 }
 0x33a   : > { %v2816_v5 = vpop.f32.mrf.mxu0  ;;  %4909 = vmatmul.mubr.msk.bf16.gmra.mxu1 %vm1086_vm1, %v3005_v21 }
 0x33b   : > { %v2817_v52 = vadd.f32 %v2816_v5, %v5811_v51  ;;  %v2963_v58 = vmax.f32 %v2825_v20, 0.0  ;;  %v2564_v51 = vpop.f32.mrf.mxu1 }
 0x33c   : > { %v4846_v44 = vpop.f32.mrf.mxu0 }
 0x33d   : > { %v2961_v50 = vmax.f32 %v2817_v52, 0.0  ;;  %v3007_v10 = vpack.c.bf16 %v2963_v58, %v2962_v1  ;;  %v2838_v53 = vadd.f32 %v4846_v44, %v5814_v19  ;;  %v4787_v30 = vpop.f32.mrf.mxu1 }
 0x33e   : > { %v2829_v62 = vpop.f32.mrf.mxu0 }
 0x33f   : > { %v3006_v42 = vpack.c.bf16 %v2961_v50, %v2960_v25  ;;  %v2830_v37 = vadd.f32 %v2829_v62, %v5821_v35  ;;  %v2966_v17 = vmax.f32 %v2838_v53, 0.0 }
 0x340   : > { %v4847_v38 = vpop.f32.mrf.mxu0 }
 0x341   : > { %v2841_v61 = vadd.f32 %v4847_v38, %v5824_v22  ;;  %4912 = vmatprep.mubr.msk.bf16.mxu1 %vm1086_vm1, %v3006_v42  ;;  %v2964_v7 = vmax.f32 %v2830_v37, 0.0 }
 0x342   : > { %v2832_v27 = vpop.f32.mrf.mxu0  ;;  %4913 = vmatmul.mubr.msk.bf16.gmra.mxu1 %vm1086_vm1, %v3007_v10 }
 0x343   : > { %v2833_v2 = vadd.f32 %v2832_v27, %v5831_v48  ;;  %v2967_v15 = vmax.f32 %v2841_v61, 0.0  ;;  %v2567_v48 = vpop.f32.mrf.mxu1 }
 0x344   : > { %v4850_v32 = vpop.f32.mrf.mxu0 }
 0x345   : > { %v2965_v63 = vmax.f32 %v2833_v2, 0.0  ;;  %v3009_v12 = vpack.c.bf16 %v2967_v15, %v2966_v17  ;;  %v2854_v14 = vadd.f32 %v4850_v32, %v5834_v31  ;;  %v4790_v39 = vpop.f32.mrf.mxu1 }
 0x346   : > { %v2845_v33 = vpop.f32.mrf.mxu0 }
 0x347   : > { %v3008_v35 = vpack.c.bf16 %v2965_v63, %v2964_v7  ;;  %v2846_v45 = vadd.f32 %v2845_v33, %v5841_v3  ;;  %v2970_v46 = vmax.f32 %v2854_v14, 0.0 }
 0x348   : > { %v4851_v22 = vpop.f32.mrf.mxu0 }
 0x349   : > { %v2857_v19 = vadd.f32 %v4851_v22, %v5844_v43  ;;  %4916 = vmatprep.mubr.msk.bf16.mxu1 %vm1086_vm1, %v3008_v35  ;;  %v2968_v26 = vmax.f32 %v2846_v45, 0.0 }
 0x34a   : > { %v2848_v18 = vpop.f32.mrf.mxu0  ;;  %4917 = vmatmul.mubr.msk.bf16.gmra.mxu1 %vm1086_vm1, %v3009_v12 }
 0x34b   : > { %v2849_v34 = vadd.f32 %v2848_v18, %v5851_v28  ;;  %v2971_v13 = vmax.f32 %v2857_v19, 0.0  ;;  %v2580_v28 = vpop.f32.mrf.mxu1 }
 0x34c   : > { %v4854_v49 = vpop.f32.mrf.mxu0 }
 0x34d   : > { %v2969_v29 = vmax.f32 %v2849_v34, 0.0  ;;  %v3011_v36 = vpack.c.bf16 %v2971_v13, %v2970_v46  ;;  %v2870_v31 = vadd.f32 %v4854_v49, %v5854_v6  ;;  %v4791_v24 = vpop.f32.mrf.mxu1 }
 0x34e   : > { %v2861_v47 = vpop.f32.mrf.mxu0 }
 0x34f   : > { %v3010_v3 = vpack.c.bf16 %v2969_v29, %v2968_v26  ;;  %v2862_v9 = vadd.f32 %v2861_v47, %v5861_v40  ;;  %v2974_v60 = vmax.f32 %v2870_v31, 0.0  ;;  %v2583_v52 = vpop.f32.mrf.mxu1 }
 0x350   : > { %v4855_v43 = vpop.f32.mrf.mxu0 }
 0x351   : > { %v2873_v59 = vadd.f32 %v4855_v43, %v4783_v0  ;;  %4920 = vmatprep.mubr.msk.bf16.mxu1 %vm1086_vm1, %v3010_v3  ;;  %v2972_v56 = vmax.f32 %v2862_v9, 0.0  ;;  %v4794_v62 = vpop.f32.mrf.mxu1 }
 0x352   : > { %v2864_v41 = vpop.f32.mrf.mxu0  ;;  %4921 = vmatmul.mubr.msk.bf16.gmra.mxu1 %vm1086_vm1, %v3011_v36  ;;  %v3634_v36 = vpop.permute.xlu1 %3633 }
 0x353   : > { %v2865_v54 = vadd.f32 %v2864_v41, %v2551_v16  ;;  %v2975_v8 = vmax.f32 %v2873_v59, 0.0  ;;  %v2596_v27 = vpop.f32.mrf.mxu1 }
 0x354   : > { %v4858_v55 = vpop.f32.mrf.mxu0 }
 0x355   : > { %v2973_v57 = vmax.f32 %v2865_v54, 0.0  ;;  %v3013_v20 = vpack.c.bf16 %v2975_v8, %v2974_v60  ;;  %v2886_v6 = vadd.f32 %v4858_v55, %v4786_v4  ;;  %v4795_v33 = vpop.f32.mrf.mxu1 }
 0x356   : > { %v2877_v21 = vpop.f32.mrf.mxu0  ;;  %v3636_v9 = vpop.permute.xlu1 %3635 }
 0x357   : > { %v3012_v23 = vpack.c.bf16 %v2973_v57, %v2972_v56  ;;  %v2878_v0 = vadd.f32 %v2877_v21, %v2564_v51  ;;  %v2978_v1 = vmax.f32 %v2886_v6, 0.0  ;;  %v2599_v14 = vpop.f32.mrf.mxu1 }
 0x358   : > { %v4859_v40 = vpop.f32.mrf.mxu0 }
 0x359   : > { %v2889_v11 = vadd.f32 %v4859_v40, %v4787_v30  ;;  %4924 = vmatprep.mubr.msk.bf16.mxu1 %vm1086_vm1, %v3012_v23  ;;  %v2976_v25 = vmax.f32 %v2878_v0, 0.0 }
 0x35a   : > { %v2880_v5 = vpop.f32.mrf.mxu0  ;;  %4925 = vmatmul.mubr.msk.bf16.gmra.mxu1 %vm1086_vm1, %v3013_v20  ;;  %v3644_v59 = vpop.permute.xlu1 %3643 }
 0x35b   : > { %v2881_v16 = vadd.f32 %v2880_v5, %v2567_v48  ;;  %v2979_v58 = vmax.f32 %v2889_v11, 0.0 }
 0x35c   : > { %v4862_v44 = vpop.f32.mrf.mxu0 }
 0x35d   : > { %v2977_v50 = vmax.f32 %v2881_v16, 0.0  ;;  %v3015_v38 = vpack.c.bf16 %v2979_v58, %v2978_v1  ;;  %v2902_v4 = vadd.f32 %v4862_v44, %v4790_v39  ;;  %v3630_v39 = vpop.permute.xlu0 %3629 }
 0x35e   : > { %v2893_v42 = vpop.f32.mrf.mxu0  ;;  %v3640_v41 = vpop.permute.xlu1 %3639 }
 0x35f   : > { %v3014_v10 = vpack.c.bf16 %v2977_v50, %v2976_v25  ;;  %v2894_v61 = vadd.f32 %v2893_v42, %v2580_v28  ;;  %v2982_v17 = vmax.f32 %v2902_v4, 0.0 }
 0x360   : > { %v4863_v37 = vpop.f32.mrf.mxu0 }
 0x361   : > { %v2905_v53 = vadd.f32 %v4863_v37, %v4791_v24  ;;  %4928 = vmatprep.mubr.msk.bf16.mxu1 %vm1086_vm1, %v3014_v10  ;;  %v2980_v7 = vmax.f32 %v2894_v61, 0.0  ;;  %v3632_v3 = vpop.permute.xlu0 %3631 }
 0x362   : > { %v2896_v51 = vpop.f32.mrf.mxu0  ;;  %4929 = vmatmul.mubr.msk.bf16.gmra.mxu1 %vm1086_vm1, %v3015_v38  ;;  %v3652_v54 = vpop.permute.xlu1 %3651 }
 0x363   : > { %v2897_v2 = vadd.f32 %v2896_v51, %v2583_v52  ;;  %v2983_v15 = vmax.f32 %v2905_v53, 0.0 }
 0x364   : > { %v4866_v32 = vpop.f32.mrf.mxu0 }
 0x365   : > { %v2981_v63 = vmax.f32 %v2897_v2, 0.0  ;;  %v3017_v12 = vpack.c.bf16 %v2983_v15, %v2982_v17  ;;  %v2918_v18 = vadd.f32 %v4866_v32, %v4794_v62  ;;  %v3642_v43 = vpop.permute.xlu0 %3641 }
 0x366   : > { %v2909_v30 = vpop.f32.mrf.mxu0  ;;  %v3648_v55 = vpop.permute.xlu1 %3647 }
 0x367   : > { %v3016_v35 = vpack.c.bf16 %v2981_v63, %v2980_v7  ;;  %v2910_v45 = vadd.f32 %v2909_v30, %v2596_v27  ;;  %v2986_v29 = vmax.f32 %v2918_v18, 0.0 }
 0x368   : > { %v4867_v22 = vpop.f32.mrf.mxu0 }
 0x369   : > { %v2921_v19 = vadd.f32 %v4867_v22, %v4795_v33  ;;  %4932 = vmatprep.mubr.msk.bf16.mxu1 %vm1086_vm1, %v3016_v35  ;;  %v2984_v49 = vmax.f32 %v2910_v45, 0.0  ;;  %v3638_v31 = vpop.permute.xlu0 %3637 }
 0x36a   : > { %v2912_v48 = vpop.f32.mrf.mxu0  ;;  %4933 = vmatmul.mubr.msk.bf16.gmra.mxu1 %vm1086_vm1, %v3017_v12  ;;  %v5894_v57 = vpop.permute.xlu1 %3659 }
 0x36b   : > { %v2913_v34 = vadd.f32 %v2912_v48, %v2599_v14  ;;  %v2987_v13 = vmax.f32 %v2921_v19, 0.0 }
 0x36d   : > { %v2985_v26 = vmax.f32 %v2913_v34, 0.0  ;;  %v3019_v47 = vpack.c.bf16 %v2987_v13, %v2986_v29  ;;  %v3650_v28 = vpop.permute.xlu0 %3649 }
 0x36e   : > { %v5896_v21 = vpop.permute.xlu1 %3655 }
 0x36f   : > { %v3018_v46 = vpack.c.bf16 %v2985_v26, %v2984_v49 }
 0x371   : > { %4936 = vmatprep.mubr.msk.bf16.mxu1 %vm1086_vm1, %v3018_v46  ;;  %v3646_v8 = vpop.permute.xlu0 %3645 }
 0x372   : > { %4937 = vmatmul.mubr.msk.bf16.gmra.mxu1 %vm1086_vm1, %v3019_v47  ;;  %v5900_v23 = vpop.permute.xlu1 %3667 }
 0x375   : > { %v3658_v56 = vpop.permute.xlu0 %3657 }
 0x376   : > { %v5904_v40 = vpop.permute.xlu1 %3663 }
 0x379   : > { %v3654_v60 = vpop.permute.xlu0 %3653 }
 0x37a   : > { %v5909_v11 = vpop.permute.xlu1 %3675 }
 0x37d   : > { %v5898_v24 = vpop.permute.xlu0 %3665 }
 0x37e   : > { %v5924_v25 = vpop.permute.xlu1 %3671 }
 0x381   : > { %v5902_v20 = vpop.permute.xlu0 %3661 }
 0x382   : > { %v5937_v61 = vpop.permute.xlu1 %3683 }
 0x385   : > { %v5906_v0 = vpop.permute.xlu0 %3673 }
 0x386   : > { %v5950_v7 = vpop.permute.xlu1 %3679 }
 0x389   : > { %v5916_v6 = vpop.permute.xlu0 %3669 }
 0x38a   : > { %v5963_v45 = vpop.permute.xlu1 %3691 }
 0x38d   : > { %v5927_v1 = vpop.permute.xlu0 %3681 }
 0x38e   : > { %v5976_v26 = vpop.permute.xlu1 %3687 }
 0x391   : > { %v5940_v4 = vpop.permute.xlu0 %3677 }
 0x395   : > { %v5953_v17 = vpop.permute.xlu0 %3689 }
 0x399   : > { %v5966_v14 = vpop.permute.xlu0 %3685 }
 0x39d   : > { %v5980_v46 = vpop.permute.xlu0 %3697 }
 0x3ba   : > { %v4878_v5 = vpop.f32.mrf.mxu1 }
 0x3bb   : > { %v3824_v52 = vsel %vm3821_vm3, %v4878_v5, %v3634_v36 }
 0x3bc   : > { %3889 = vst.msk [vmem:[%s5914_s17 + $0x10] sm:$0xff] %vm3886_vm4, %v3824_v52  ;;  %v3182_v16 = vpop.f32.mrf.mxu1 }
 0x3bd   : > { %v3822_v58 = vsel %vm3821_vm3, %v3182_v16, %v3630_v39 }
 0x3be   : > { %3887 = vst.msk [vmem:[%s5914_s17] sm:$0xff] %vm3886_vm4, %v3822_v58  ;;  %v4879_v44 = vpop.f32.mrf.mxu1 }
 0x3bf   : > { %v3825_v50 = vsel %vm3821_vm3, %v4879_v44, %v3636_v9  ;;  %v5992_v9 = vpop.permute.xlu1 %3699 }
 0x3c0   : > { %3890 = vst.msk [vmem:[%s5914_s17 + $0x18] sm:$0xff] %vm3886_vm4, %v3825_v50  ;;  %v3185_v62 = vpop.f32.mrf.mxu1 }
 0x3c1   : > { %v3823_v42 = vsel %vm3821_vm3, %v3185_v62, %v3632_v3 }
 0x3c2   : > { %3888 = vst.msk [vmem:[%s5914_s17 + $0x8] sm:$0xff] %vm3886_vm4, %v3823_v42  ;;  %v4882_v10 = vpop.f32.mrf.mxu1 }
 0x3c3   : > { %v3828_v38 = vsel %vm3821_vm3, %v4882_v10, %v3642_v43 }
 0x3c4   : > { %3893 = vst.msk [vmem:[%s5914_s17 + $0x30] sm:$0xff] %vm3886_vm4, %v3828_v38  ;;  %v3198_v37 = vpop.f32.mrf.mxu1 }
 0x3c5   : > { %v3826_v53 = vsel %vm3821_vm3, %v3198_v37, %v3638_v31  ;;  %v3694_v31 = vpop.permute.xlu0 %3693 }
 0x3c6   : > { %3891 = vst.msk [vmem:[%s5914_s17 + $0x20] sm:$0xff] %vm3886_vm4, %v3826_v53  ;;  %v4883_v27 = vpop.f32.mrf.mxu1 }
 0x3c7   : > { %v3829_v51 = vsel %vm3821_vm3, %v4883_v27, %v3644_v59 }
 0x3c8   : > { %3894 = vst.msk [vmem:[%s5914_s17 + $0x38] sm:$0xff] %vm3886_vm4, %v3829_v51  ;;  %v3201_v2 = vpop.f32.mrf.mxu1 }
 0x3c9   : > { %v3827_v15 = vsel %vm3821_vm3, %v3201_v2, %v3640_v41 }
 0x3ca   : > { %3892 = vst.msk [vmem:[%s5914_s17 + $0x28] sm:$0xff] %vm3886_vm4, %v3827_v15  ;;  %v4886_v32 = vpop.f32.mrf.mxu1 }
 0x3cb   : > { %v3832_v63 = vsel %vm3821_vm3, %v4886_v32, %v3650_v28 }
 0x3cc   : > { %3897 = vst.msk [vmem:[%s5914_s17 + $0x50] sm:$0xff] %vm3886_vm4, %v3832_v63  ;;  %v3214_v33 = vpop.f32.mrf.mxu1 }
 0x3cd   : > { %v3830_v30 = vsel %vm3821_vm3, %v3214_v33, %v3646_v8 }
 0x3ce   : > { %3895 = vst.msk [vmem:[%s5914_s17 + $0x40] sm:$0xff] %vm3886_vm4, %v3830_v30  ;;  %v4887_v35 = vpop.f32.mrf.mxu1 }
 0x3cf   : > { %v3833_v12 = vsel %vm3821_vm3, %v4887_v35, %v3652_v54 }
 0x3d0   : > { %3898 = vst.msk [vmem:[%s5914_s17 + $0x58] sm:$0xff] %vm3886_vm4, %v3833_v12  ;;  %v3217_v22 = vpop.f32.mrf.mxu1 }
 0x3d1   : > { %v3831_v19 = vsel %vm3821_vm3, %v3217_v22, %v3648_v55 }
 0x3d2   : > { %3896 = vst.msk [vmem:[%s5914_s17 + $0x48] sm:$0xff] %vm3886_vm4, %v3831_v19  ;;  %v4890_v18 = vpop.f32.mrf.mxu1 }
 0x3d3   : > { %v3836_v48 = vsel %vm3821_vm3, %v4890_v18, %v3658_v56  ;;  %v3696_v56 = vpop.permute.xlu1 %3695 }
 0x3d4   : > { %3901 = vst.msk [vmem:[%s5914_s17 + $0x70] sm:$0xff] %vm3886_vm4, %v3836_v48  ;;  %v3230_v34 = vpop.f32.mrf.mxu1 }
 0x3d5   : > { %v3834_v13 = vsel %vm3821_vm3, %v3230_v34, %v3654_v60  ;;  %v3706_v60 = vpop.permute.xlu0 %3705 }
 0x3d6   : > { %3899 = vst.msk [vmem:[%s5914_s17 + $0x60] sm:$0xff] %vm3886_vm4, %v3834_v13  ;;  %v4891_v49 = vpop.f32.mrf.mxu1 }
 0x3d7   : > { %v3837_v29 = vsel %vm3821_vm3, %v4891_v49, %v5894_v57 }
 0x3d8   : > { %3902 = vst.msk [vmem:[%s5914_s17 + $0x78] sm:$0xff] %vm3886_vm4, %v3837_v29  ;;  %v3233_v47 = vpop.f32.mrf.mxu1 }
 0x3d9   : > { %v3835_v39 = vsel %vm3821_vm3, %v3233_v47, %v5896_v21  ;;  %v3702_v52 = vpop.permute.xlu0 %3701 }
 0x3da   : > { %3900 = vst.msk [vmem:[%s5914_s17 + $0x68] sm:$0xff] %vm3886_vm4, %v3835_v39  ;;  %v4894_v3 = vpop.f32.mrf.mxu1 }
 0x3db   : > { %v3840_v36 = vsel %vm3821_vm3, %v4894_v3, %v5898_v24 }
 0x3dc   : > { %3905 = vst.msk [vmem:[%s5914_s17 + $0x90] sm:$0xff] %vm3886_vm4, %v3840_v36  ;;  %v3246_v43 = vpop.f32.mrf.mxu1 }
 0x3dd   : > { %v3838_v59 = vsel %vm3821_vm3, %v3246_v43, %v5902_v20  ;;  %v3714_v62 = vpop.permute.xlu0 %3713 }
 0x3de   : > { %3903 = vst.msk [vmem:[%s5914_s17 + $0x80] sm:$0xff] %vm3886_vm4, %v3838_v59  ;;  %v4895_v41 = vpop.f32.mrf.mxu1 }
 0x3df   : > { %v3841_v28 = vsel %vm3821_vm3, %v4895_v41, %v5900_v23 }
 0x3e0   : > { %3906 = vst.msk [vmem:[%s5914_s17 + $0x98] sm:$0xff] %vm3886_vm4, %v3841_v28  ;;  %v3249_v54 = vpop.f32.mrf.mxu1 }
 0x3e1   : > { %v3839_v8 = vsel %vm3821_vm3, %v3249_v54, %v5904_v40 }
 0x3e2   : > { %3904 = vst.msk [vmem:[%s5914_s17 + $0x88] sm:$0xff] %vm3886_vm4, %v3839_v8  ;;  %v4898_v55 = vpop.f32.mrf.mxu1 }
 0x3e3   : > { %v3844_v57 = vsel %vm3821_vm3, %v4898_v55, %v5906_v0  ;;  %v3708_v0 = vpop.permute.xlu1 %3707 }
 0x3e4   : > { %3909 = vst.msk [vmem:[%s5914_s17 + $0xb0] sm:$0xff] %vm3886_vm4, %v3844_v57  ;;  %v3262_v21 = vpop.f32.mrf.mxu1 }
 0x3e5   : > { %v3842_v24 = vsel %vm3821_vm3, %v3262_v21, %v5916_v6 }
 0x3e6   : > { %3907 = vst.msk [vmem:[%s5914_s17 + $0xa0] sm:$0xff] %vm3886_vm4, %v3842_v24  ;;  %v4899_v23 = vpop.f32.mrf.mxu1 }
 0x3e7   : > { %v3845_v20 = vsel %vm3821_vm3, %v4899_v23, %v5909_v11 }
 0x3e8   : > { %3910 = vst.msk [vmem:[%s5914_s17 + $0xb8] sm:$0xff] %vm3886_vm4, %v3845_v20  ;;  %v3265_v40 = vpop.f32.mrf.mxu1 }
 0x3e9   : > { %v3843_v5 = vsel %vm3821_vm3, %v3265_v40, %v5924_v25  ;;  %v3704_v25 = vpop.permute.xlu1 %3703 }
 0x3ea   : > { %3908 = vst.msk [vmem:[%s5914_s17 + $0xa8] sm:$0xff] %vm3886_vm4, %v3843_v5  ;;  %v4902_v16 = vpop.f32.mrf.mxu1 }
 0x3eb   : > { %v3848_v6 = vsel %vm3821_vm3, %v4902_v16, %v5927_v1 }
 0x3ec   : > { %3913 = vst.msk [vmem:[%s5914_s17 + $0xd0] sm:$0xff] %vm3886_vm4, %v3848_v6  ;;  %v3278_v11 = vpop.f32.mrf.mxu1 }
 0x3ed   : > { %v3846_v58 = vsel %vm3821_vm3, %v3278_v11, %v5940_v4  ;;  %v3710_v4 = vpop.permute.xlu0 %3709 }
 0x3ee   : > { %3911 = vst.msk [vmem:[%s5914_s17 + $0xc0] sm:$0xff] %vm3886_vm4, %v3846_v58  ;;  %v4903_v44 = vpop.f32.mrf.mxu1 }
 0x3ef   : > { %v3849_v50 = vsel %vm3821_vm3, %v4903_v44, %v5937_v61  ;;  %v3716_v61 = vpop.permute.xlu1 %3715 }
 0x3f0   : > { %3914 = vst.msk [vmem:[%s5914_s17 + $0xd8] sm:$0xff] %vm3886_vm4, %v3849_v50  ;;  %v3281_v42 = vpop.f32.mrf.mxu1 }
 0x3f1   : > { %v3847_v1 = vsel %vm3821_vm3, %v3281_v42, %v5950_v7 }
 0x3f2   : > { %3912 = vst.msk [vmem:[%s5914_s17 + $0xc8] sm:$0xff] %vm3886_vm4, %v3847_v1  ;;  %v4906_v10 = vpop.f32.mrf.mxu1 }
 0x3f3   : > { %v3852_v38 = vsel %vm3821_vm3, %v4906_v10, %v5953_v17  ;;  %v3712_v7 = vpop.permute.xlu1 %3711  ;;  %v3722_v17 = vpop.permute.xlu0 %3721 }
 0x3f4   : > { %3917 = vst.msk [vmem:[%s5914_s17 + $0xf0] sm:$0xff] %vm3886_vm4, %v3852_v38  ;;  %v3294_v37 = vpop.f32.mrf.mxu1 }
 0x3f5   : > { %v3850_v53 = vsel %vm3821_vm3, %v3294_v37, %v5966_v14 }
 0x3f6   : > { %3915 = vst.msk [vmem:[%s5914_s17 + $0xe0] sm:$0xff] %vm3886_vm4, %v3850_v53  ;;  %v4907_v27 = vpop.f32.mrf.mxu1 }
 0x3f7   : > { %v3853_v51 = vsel %vm3821_vm3, %v4907_v27, %v5963_v45  ;;  %v3724_v45 = vpop.permute.xlu1 %3723  ;;  %v3718_v14 = vpop.permute.xlu0 %3717 }
 0x3f8   : > { %3918 = vst.msk [vmem:[%s5914_s17 + $0xf8] sm:$0xff] %vm3886_vm4, %v3853_v51  ;;  %v3297_v2 = vpop.f32.mrf.mxu1 }
 0x3f9   : > { %v3851_v15 = vsel %vm3821_vm3, %v3297_v2, %v5976_v26 }
 0x3fa   : > { %3916 = vst.msk [vmem:[%s5914_s17 + $0xe8] sm:$0xff] %vm3886_vm4, %v3851_v15  ;;  %v4910_v32 = vpop.f32.mrf.mxu1 }
 0x3fb   : > { %v3856_v63 = vsel %vm3821_vm3, %v4910_v32, %v5980_v46  ;;  %v3720_v26 = vpop.permute.xlu1 %3719  ;;  %v3730_v46 = vpop.permute.xlu0 %3729 }
 0x3fc   : > { %3921 = vst.msk [vmem:[%s5914_s17 + $0x110] sm:$0xff] %vm3886_vm4, %v3856_v63  ;;  %v3310_v33 = vpop.f32.mrf.mxu1 }
 0x3fd   : > { %v3854_v30 = vsel %vm3821_vm3, %v3310_v33, %v3694_v31 }
 0x3fe   : > { %3919 = vst.msk [vmem:[%s5914_s17 + $0x100] sm:$0xff] %vm3886_vm4, %v3854_v30  ;;  %v4911_v35 = vpop.f32.mrf.mxu1 }
 0x3ff   : > { %v3857_v12 = vsel %vm3821_vm3, %v4911_v35, %v5992_v9  ;;  %v3732_v9 = vpop.permute.xlu1 %3731  ;;  %v3726_v31 = vpop.permute.xlu0 %3725 }
 0x400   : > { %3922 = vst.msk [vmem:[%s5914_s17 + $0x118] sm:$0xff] %vm3886_vm4, %v3857_v12  ;;  %v3313_v22 = vpop.f32.mrf.mxu1 }
 0x401   : > { %v3855_v19 = vsel %vm3821_vm3, %v3313_v22, %v3696_v56 }
 0x402   : > { %3920 = vst.msk [vmem:[%s5914_s17 + $0x108] sm:$0xff] %vm3886_vm4, %v3855_v19  ;;  %v4914_v18 = vpop.f32.mrf.mxu1 }
 0x403   : > { %v3860_v48 = vsel %vm3821_vm3, %v4914_v18, %v3706_v60  ;;  %v3728_v56 = vpop.permute.xlu1 %3727  ;;  %v3738_v60 = vpop.permute.xlu0 %3737 }
 0x404   : > { %3925 = vst.msk [vmem:[%s5914_s17 + $0x130] sm:$0xff] %vm3886_vm4, %v3860_v48  ;;  %v3326_v34 = vpop.f32.mrf.mxu1 }
 0x405   : > { %v3858_v13 = vsel %vm3821_vm3, %v3326_v34, %v3702_v52 }
 0x406   : > { %3923 = vst.msk [vmem:[%s5914_s17 + $0x120] sm:$0xff] %vm3886_vm4, %v3858_v13  ;;  %v4915_v49 = vpop.f32.mrf.mxu1 }
 0x407   : > { %v3861_v29 = vsel %vm3821_vm3, %v4915_v49, %v3708_v0  ;;  %v3740_v0 = vpop.permute.xlu1 %3739  ;;  %v3734_v52 = vpop.permute.xlu0 %3733 }
 0x408   : > { %3926 = vst.msk [vmem:[%s5914_s17 + $0x138] sm:$0xff] %vm3886_vm4, %v3861_v29  ;;  %v3329_v47 = vpop.f32.mrf.mxu1 }
 0x409   : > { %v3859_v39 = vsel %vm3821_vm3, %v3329_v47, %v3704_v25 }
 0x40a   : > { %3924 = vst.msk [vmem:[%s5914_s17 + $0x128] sm:$0xff] %vm3886_vm4, %v3859_v39  ;;  %v4918_v3 = vpop.f32.mrf.mxu1 }
 0x40b   : > { %v3864_v36 = vsel %vm3821_vm3, %v4918_v3, %v3714_v62  ;;  %v3736_v25 = vpop.permute.xlu1 %3735  ;;  %v3746_v62 = vpop.permute.xlu0 %3745 }
 0x40c   : > { %3929 = vst.msk [vmem:[%s5914_s17 + $0x150] sm:$0xff] %vm3886_vm4, %v3864_v36  ;;  %v3342_v43 = vpop.f32.mrf.mxu1 }
 0x40d   : > { %v3862_v59 = vsel %vm3821_vm3, %v3342_v43, %v3710_v4 }
 0x40e   : > { %3927 = vst.msk [vmem:[%s5914_s17 + $0x140] sm:$0xff] %vm3886_vm4, %v3862_v59  ;;  %v4919_v41 = vpop.f32.mrf.mxu1 }
 0x40f   : > { %v3865_v28 = vsel %vm3821_vm3, %v4919_v41, %v3716_v61  ;;  %v3748_v61 = vpop.permute.xlu1 %3747  ;;  %v3742_v4 = vpop.permute.xlu0 %3741 }
 0x410   : > { %3930 = vst.msk [vmem:[%s5914_s17 + $0x158] sm:$0xff] %vm3886_vm4, %v3865_v28  ;;  %v3345_v54 = vpop.f32.mrf.mxu1 }
 0x411   : > { %v3863_v8 = vsel %vm3821_vm3, %v3345_v54, %v3712_v7 }
 0x412   : > { %3928 = vst.msk [vmem:[%s5914_s17 + $0x148] sm:$0xff] %vm3886_vm4, %v3863_v8  ;;  %v4922_v55 = vpop.f32.mrf.mxu1 }
 0x413   : > { %v3868_v57 = vsel %vm3821_vm3, %v4922_v55, %v3722_v17  ;;  %v3744_v7 = vpop.permute.xlu1 %3743  ;;  %v3750_v17 = vpop.permute.xlu0 %3749 }
 0x414   : > { %3933 = vst.msk [vmem:[%s5914_s17 + $0x170] sm:$0xff] %vm3886_vm4, %v3868_v57  ;;  %v3358_v21 = vpop.f32.mrf.mxu1 }
 0x415   : > { %v3866_v24 = vsel %vm3821_vm3, %v3358_v21, %v3718_v14 }
 0x416   : > { %3931 = vst.msk [vmem:[%s5914_s17 + $0x160] sm:$0xff] %vm3886_vm4, %v3866_v24  ;;  %v4923_v23 = vpop.f32.mrf.mxu1 }
 0x417   : > { %v3869_v20 = vsel %vm3821_vm3, %v4923_v23, %v3724_v45  ;;  %v3752_v22 = vpop.permute.xlu1 %3751  ;;  %v3754_v14 = vpop.permute.xlu0 %3753 }
 0x418   : > { %3934 = vst.msk [vmem:[%s5914_s17 + $0x178] sm:$0xff] %vm3886_vm4, %v3869_v20  ;;  %v3361_v40 = vpop.f32.mrf.mxu1 }
 0x419   : > { %v3867_v5 = vsel %vm3821_vm3, %v3361_v40, %v3720_v26 }
 0x41a   : > { %3932 = vst.msk [vmem:[%s5914_s17 + $0x168] sm:$0xff] %vm3886_vm4, %v3867_v5  ;;  %v4926_v16 = vpop.f32.mrf.mxu1 }
 0x41b   : > { %v3872_v6 = vsel %vm3821_vm3, %v4926_v16, %v3730_v46  ;;  %v3756_v49 = vpop.permute.xlu1 %3755 }
 0x41c   : > { %3937 = vst.msk [vmem:[%s5914_s17 + $0x190] sm:$0xff] %vm3886_vm4, %v3872_v6  ;;  %v3374_v11 = vpop.f32.mrf.mxu1 }
 0x41d   : > { %v3870_v58 = vsel %vm3821_vm3, %v3374_v11, %v3726_v31 }
 0x41e   : > { %3935 = vst.msk [vmem:[%s5914_s17 + $0x180] sm:$0xff] %vm3886_vm4, %v3870_v58  ;;  %v4927_v44 = vpop.f32.mrf.mxu1 }
 0x41f   : > { %v3873_v50 = vsel %vm3821_vm3, %v4927_v44, %v3732_v9 }
 0x420   : > { %3938 = vst.msk [vmem:[%s5914_s17 + $0x198] sm:$0xff] %vm3886_vm4, %v3873_v50  ;;  %v3377_v42 = vpop.f32.mrf.mxu1 }
 0x421   : > { %v3871_v1 = vsel %vm3821_vm3, %v3377_v42, %v3728_v56 }
 0x422   : > { %3936 = vst.msk [vmem:[%s5914_s17 + $0x188] sm:$0xff] %vm3886_vm4, %v3871_v1  ;;  %v4930_v10 = vpop.f32.mrf.mxu1 }
 0x423   : > { %v3876_v38 = vsel %vm3821_vm3, %v4930_v10, %v3738_v60 }
 0x424   : > { %3941 = vst.msk [vmem:[%s5914_s17 + $0x1b0] sm:$0xff] %vm3886_vm4, %v3876_v38  ;;  %v3390_v37 = vpop.f32.mrf.mxu1 }
 0x425   : > { %v3874_v53 = vsel %vm3821_vm3, %v3390_v37, %v3734_v52 }
 0x426   : > { %3939 = vst.msk [vmem:[%s5914_s17 + $0x1a0] sm:$0xff] %vm3886_vm4, %v3874_v53  ;;  %v4931_v27 = vpop.f32.mrf.mxu1 }
 0x427   : > { %v3877_v51 = vsel %vm3821_vm3, %v4931_v27, %v3740_v0 }
 0x428   : > { %3942 = vst.msk [vmem:[%s5914_s17 + $0x1b8] sm:$0xff] %vm3886_vm4, %v3877_v51  ;;  %v3393_v2 = vpop.f32.mrf.mxu1 }
 0x429   : > { %v3875_v15 = vsel %vm3821_vm3, %v3393_v2, %v3736_v25 }
 0x42a   : > { %3940 = vst.msk [vmem:[%s5914_s17 + $0x1a8] sm:$0xff] %vm3886_vm4, %v3875_v15  ;;  %v4934_v32 = vpop.f32.mrf.mxu1 }
 0x42b   : > { %v3880_v63 = vsel %vm3821_vm3, %v4934_v32, %v3746_v62 }
 0x42c   : > { %3945 = vst.msk [vmem:[%s5914_s17 + $0x1d0] sm:$0xff] %vm3886_vm4, %v3880_v63  ;;  %v3406_v33 = vpop.f32.mrf.mxu1 }
 0x42d   : > { %v3878_v30 = vsel %vm3821_vm3, %v3406_v33, %v3742_v4 }
 0x42e   : > { %3943 = vst.msk [vmem:[%s5914_s17 + $0x1c0] sm:$0xff] %vm3886_vm4, %v3878_v30  ;;  %v4935_v35 = vpop.f32.mrf.mxu1 }
 0x42f   : > { %v3881_v12 = vsel %vm3821_vm3, %v4935_v35, %v3748_v61 }
 0x430   : > { %3946 = vst.msk [vmem:[%s5914_s17 + $0x1d8] sm:$0xff] %vm3886_vm4, %v3881_v12  ;;  %v3409_v45 = vpop.f32.mrf.mxu1 }
 0x431   : > { %v3879_v19 = vsel %vm3821_vm3, %v3409_v45, %v3744_v7 }
 0x432   : > { %3944 = vst.msk [vmem:[%s5914_s17 + $0x1c8] sm:$0xff] %vm3886_vm4, %v3879_v19  ;;  %v4938_v18 = vpop.f32.mrf.mxu1 }
 0x433   : > { %v3884_v48 = vsel %vm3821_vm3, %v4938_v18, %v3754_v14 }
 0x434   : > { %3949 = vst.msk [vmem:[%s5914_s17 + $0x1f0] sm:$0xff] %vm3886_vm4, %v3884_v48  ;;  %v3422_v34 = vpop.f32.mrf.mxu1 }
 0x435   : > { %v3882_v13 = vsel %vm3821_vm3, %v3422_v34, %v3750_v17 }
 0x436   : > { %3947 = vst.msk [vmem:[%s5914_s17 + $0x1e0] sm:$0xff] %vm3886_vm4, %v3882_v13  ;;  %v4939_v26 = vpop.f32.mrf.mxu1 }
 0x437   : > { %v3885_v29 = vsel %vm3821_vm3, %v4939_v26, %v3756_v49 }
 0x438   : > { %3950 = vst.msk [vmem:[%s5914_s17 + $0x1f8] sm:$0xff] %vm3886_vm4, %v3885_v29  ;;  %v3425_v46 = vpop.f32.mrf.mxu1 }
 0x439   : > { %v3883_v47 = vsel %vm3821_vm3, %v3425_v46, %v3752_v22 }
 0x43a   : > { %3948 = vst.msk [vmem:[%s5914_s17 + $0x1e8] sm:$0xff] %vm3886_vm4, %v3883_v47 }
 0x43b PF: > { %s18_s27 = sadd.s32 1, %s5166_s27  }
 0x43c   : > { %p15_p4 = scmp.ge.s32.totalorder %s18_s27, 4  }
 0x43e   :  { %17 = sbr.rel (!%p15_p4) target bundleno = 1 (0x1), region = 85 }

</bundles_post_ra>
